<compile_context>
chip_gen: v6e
topology: v6e:2x2x1
jax: 0.10.0
libtpu: 0.0.40
codegen_flags: <defaults>
</compile_context>

<pallas_src>
import functools

import jax
import jax.numpy as jnp
from jax import lax
from jax.experimental import pallas as pl
from jax.experimental.pallas import tpu as pltpu

_MiB = 1024 * 1024


def _vmem_params(nbytes, dims=None):
    # Computed VMEM budget (+ margin), clamped to a range that is safe on
    # every generation (v7x has only 64 MiB physical VMEM per TensorCore).
    lim = int(min(max(nbytes + 8 * _MiB, 32 * _MiB), 64 * _MiB))
    return pltpu.CompilerParams(dimension_semantics=dims, vmem_limit_bytes=lim)


def _bce_rows(sc):
    # Stable BCE-with-logits; labels: row 0 -> 1 (clean), row 1 -> 0 (corrupt).
    y = (lax.broadcasted_iota(jnp.int32, (2, 1), 0) == 0).astype(jnp.float32)
    return jnp.maximum(sc, 0.0) - sc * y + jnp.log1p(jnp.exp(-jnp.abs(sc)))


# ------------------------------------------------------- fused small-graph --
def _fused_kernel(x_ref, xs_ref, adj_ref, w_ref, b_ref, a_ref, wbilt_ref,
                  bb_ref, mcol_ref, mrow_ref, invn_ref,
                  logits_ref, lsum_ref):
    a = a_ref[...]                                                  # (1,1) PReLU slope
    w = w_ref[...]
    # phase 0: Z = X @ W for both branches (bf16 MXU, f32 accumulation)
    z1 = jnp.dot(x_ref[...], w, preferred_element_type=jnp.float32).astype(jnp.bfloat16)
    z2 = jnp.dot(xs_ref[...], w, preferred_element_type=jnp.float32).astype(jnp.bfloat16)
    # phase 1: H = PReLU(adj @ Z + b)
    adj = adj_ref[...]
    b = b_ref[...]
    h1 = jnp.dot(adj, z1, preferred_element_type=jnp.float32) + b
    h2 = jnp.dot(adj, z2, preferred_element_type=jnp.float32) + b
    h1 = jnp.where(h1 > 0.0, h1, a * h1)
    h2 = jnp.where(h2 > 0.0, h2, a * h2)
    # readout: c = sigmoid(mean over VALID nodes of h1); u = (W_bil @ c)^T
    colsum = jnp.sum(h1 * mcol_ref[...], axis=0, keepdims=True)     # (1, H)
    c = jax.nn.sigmoid(colsum * invn_ref[...])
    u = jnp.dot(c, wbilt_ref[...], preferred_element_type=jnp.float32)
    u_bf = u.astype(jnp.bfloat16)
    # scores: sc[i] = h[i] @ u + b_bil, lane-dense (1, N) via last-dim contraction
    dn = (((1,), (1,)), ((), ()))
    sc1 = lax.dot_general(u_bf, h1.astype(jnp.bfloat16), dn,
                          preferred_element_type=jnp.float32) + bb_ref[...]
    sc2 = lax.dot_general(u_bf, h2.astype(jnp.bfloat16), dn,
                          preferred_element_type=jnp.float32) + bb_ref[...]
    sc = jnp.concatenate([sc1, sc2], axis=0)                        # (2, N_pad)
    logits_ref[...] = sc
    l = _bce_rows(sc) * mrow_ref[...]                               # drop padded nodes
    lsum_ref[...] = jnp.sum(jnp.sum(l, axis=1, keepdims=True), axis=0, keepdims=True)


# ----------------------------------------------------------------- kernel A --
def _xw_kernel(x_ref, w_ref, z_ref):
    # Z tile = X tile @ W   (bf16 operands, f32 MXU accumulation, bf16 store)
    z_ref[...] = jnp.dot(x_ref[...], w_ref[...],
                         preferred_element_type=jnp.float32).astype(jnp.bfloat16)


# ----------------------------------------------------------------- kernel B --
def _prop_kernel(a_ref, adj_ref, z1_ref, z2_ref, b_ref, mask_ref,
                 h1_ref, h2_ref, csum_ref):
    a = a_ref[...]                                                  # (1,1) PReLU slope
    adj = adj_ref[...]                                              # (TP, N_pad) bf16
    b = b_ref[...]                                                  # (1, H)
    h1 = jnp.dot(adj, z1_ref[...], preferred_element_type=jnp.float32) + b
    h1 = jnp.where(h1 > 0.0, h1, a * h1)
    h2 = jnp.dot(adj, z2_ref[...], preferred_element_type=jnp.float32) + b
    h2 = jnp.where(h2 > 0.0, h2, a * h2)
    # per-tile masked column sums of h1 (clean branch) for the mean readout
    csum_ref[0] = jnp.sum(h1 * mask_ref[...], axis=0, keepdims=True)
    h1_ref[...] = h1.astype(jnp.bfloat16)
    h2_ref[...] = h2.astype(jnp.bfloat16)


# ----------------------------------------------------------------- kernel C --
def _readout_kernel(invn_ref, csum_ref, wbilt_ref, u_ref):
    colsum = jnp.sum(csum_ref[:, 0, :], axis=0, keepdims=True)      # (1, H)
    c = jax.nn.sigmoid(colsum * invn_ref[...])                      # summary vector
    u = jnp.dot(c, wbilt_ref[...], preferred_element_type=jnp.float32)
    u_ref[...] = u.astype(jnp.bfloat16)                             # (1, H) = (W_bil @ c)^T


# ----------------------------------------------------------------- kernel D --
def _score_kernel(bb_ref, u_ref, h1_ref, h2_ref, mask_ref, logits_ref, lpart_ref):
    u = u_ref[...]                                                  # (1, H) bf16
    dn = (((1,), (1,)), ((), ()))
    # bf16 x bf16 -> f32, lane-dense (1, TILE) blocks, no in-kernel transpose
    sc1 = lax.dot_general(u, h1_ref[...], dn,
                          preferred_element_type=jnp.float32) + bb_ref[...]
    sc2 = lax.dot_general(u, h2_ref[...], dn,
                          preferred_element_type=jnp.float32) + bb_ref[...]
    sc = jnp.concatenate([sc1, sc2], axis=0)                        # (2, TILE)
    logits_ref[...] = sc
    l = _bce_rows(sc) * mask_ref[...]                               # drop padded nodes
    lpart_ref[0] = jnp.sum(jnp.sum(l, axis=1, keepdims=True), axis=0, keepdims=True)


# ------------------------------------------------------------------ wrapper --
@functools.partial(jax.jit, static_argnames=("tile_prop", "tile_io", "force_tiled"))
def dgi_forward(features, adj, perm, w_gcn, b_gcn, prelu_a, w_bil, b_bil,
                *, tile_prop=256, tile_io=512, force_tiled=False):
    """DGI forward. Returns (logits (1, 2N), scalar BCEWithLogits loss)."""
    n, f = features.shape
    hid = w_gcn.shape[1]

    # --- shared prep: cast to bf16 BEFORE padding; pad F to a lane multiple ---
    f_pad = pl.cdiv(f, 128) * 128
    x_bf = features.astype(jnp.bfloat16)
    w_bf = w_gcn.astype(jnp.bfloat16)
    if f_pad != f:
        x_bf = jnp.pad(x_bf, ((0, 0), (0, f_pad - f)))
        w_bf = jnp.pad(w_bf, ((0, f_pad - f), (0, 0)))
    adj_bf = adj.astype(jnp.bfloat16)

    bias = b_gcn.reshape(1, hid).astype(jnp.float32)
    a_11 = jnp.asarray(prelu_a, jnp.float32).reshape(1, 1)
    bb_11 = jnp.asarray(b_bil, jnp.float32).reshape(1, 1)
    invn_11 = jnp.asarray(1.0 / n, jnp.float32).reshape(1, 1)
    wbilt = w_bil.T.astype(jnp.float32)
    perm_i = perm.astype(jnp.int32)

    # Static fused-path VMEM estimate: adj + x + xs + w + (z bf16, h f32) x 2 + outputs.
    n128 = pl.cdiv(n, 128) * 128
    fused_bytes = (n128 * n128 * 2 + 2 * n128 * f_pad * 2 + f_pad * hid * 2
                   + 2 * n128 * hid * (2 + 4) + 8 * n128 * 4)
    use_fused = (not force_tiled) and fused_bytes <= 24 * _MiB

    if use_fused:
        # ---------------- single fused pallas_call: everything VMEM-resident --
        n_pad = n128
        pad = n_pad - n
        xs_bf = x_bf[perm_i, :]                      # corrupted features (row gather)
        if pad:
            x_p = jnp.pad(x_bf, ((0, pad), (0, 0)))
            xs_p = jnp.pad(xs_bf, ((0, pad), (0, 0)))
            adj_p = jnp.pad(adj_bf, ((0, pad), (0, pad)))
        else:
            x_p, xs_p, adj_p = x_bf, xs_bf, adj_bf
        mask_col = (jnp.arange(n_pad) < n).astype(jnp.float32).reshape(n_pad, 1)
        mask_row = (jnp.arange(n_pad) < n).astype(jnp.float32).reshape(1, n_pad)

        vm = pl.BlockSpec(memory_space=pltpu.MemorySpace.VMEM)
        logits2, lsum = pl.pallas_call(
            _fused_kernel,
            out_shape=(jax.ShapeDtypeStruct((2, n_pad), jnp.float32),
                       jax.ShapeDtypeStruct((1, 1), jnp.float32)),
            in_specs=[vm] * 11,
            out_specs=(vm, vm),
            compiler_params=_vmem_params(fused_bytes),
        )(x_p, xs_p, adj_p, w_bf, bias, a_11, wbilt, bb_11,
          mask_col, mask_row, invn_11)
        loss_total = lsum[0, 0]
    else:
        # ---------------- row-tiled 4-stage pipeline (large graphs) -----------
        tile_p = min(tile_prop, n128)
        tile_a = min(tile_io, n128)
        tile_max = max(tile_p, tile_a)
        n_pad = pl.cdiv(n, tile_max) * tile_max
        pad = n_pad - n
        x_p = jnp.pad(x_bf, ((0, pad), (0, 0))) if pad else x_bf
        adj_p = jnp.pad(adj_bf, ((0, pad), (0, pad))) if pad else adj_bf
        nt_a = n_pad // tile_a
        nt_p = n_pad // tile_p

        # --- phase 0: Z = X @ W  (large streaming row tile, "parallel") -------
        vmem_a = 2 * (tile_a * f_pad * 2 + f_pad * hid * 2 + tile_a * hid * 2)
        z = pl.pallas_call(
            _xw_kernel,
            out_shape=jax.ShapeDtypeStruct((n_pad, hid), jnp.bfloat16),
            grid=(nt_a,),
            in_specs=[pl.BlockSpec((tile_a, f_pad), lambda i: (i, 0)),
                      pl.BlockSpec((f_pad, hid), lambda i: (0, 0))],
            out_specs=pl.BlockSpec((tile_a, hid), lambda i: (i, 0)),
            compiler_params=_vmem_params(vmem_a, ("parallel",)),
        )(x_p, w_bf)

        # corruption: shuf = X[perm] => Z_shuf = Z[perm]  (pure row gather; valid
        # because padded feature rows are zero, hence padded Z rows are zero).
        perm_pad = perm_i
        if pad:
            perm_pad = jnp.concatenate(
                [perm_pad, jnp.arange(n, n_pad, dtype=jnp.int32)])
        z_shuf = z[perm_pad, :]

        mask_col = (jnp.arange(n_pad) < n).astype(jnp.float32).reshape(n_pad, 1)
        mask_row = (jnp.arange(n_pad) < n).astype(jnp.float32).reshape(1, n_pad)

        # --- phase 1: H = PReLU(adj @ Z + b), clean + corrupted, + col sums ---
        vmem_p = (2 * tile_p * n_pad * 2            # adj row tiles (double-buffered)
                  + 2 * 2 * n_pad * hid * 2         # resident Z, Z_shuf
                  + 2 * 2 * tile_p * hid * 2        # h1, h2 output tiles
                  + 2 * tile_p * hid * 4)           # f32 intermediates
        h1, h2, csum_parts = pl.pallas_call(
            _prop_kernel,
            out_shape=(jax.ShapeDtypeStruct((n_pad, hid), jnp.bfloat16),
                       jax.ShapeDtypeStruct((n_pad, hid), jnp.bfloat16),
                       jax.ShapeDtypeStruct((nt_p, 1, hid), jnp.float32)),
            grid=(nt_p,),
            in_specs=[pl.BlockSpec((1, 1), lambda i: (0, 0)),           # PReLU slope
                      pl.BlockSpec((tile_p, n_pad), lambda i: (i, 0)),  # adj row tile
                      pl.BlockSpec((n_pad, hid), lambda i: (0, 0)),     # Z (resident)
                      pl.BlockSpec((n_pad, hid), lambda i: (0, 0)),     # Z_shuf (resident)
                      pl.BlockSpec((1, hid), lambda i: (0, 0)),         # b_gcn
                      pl.BlockSpec((tile_p, 1), lambda i: (i, 0))],     # valid-row mask
            out_specs=(pl.BlockSpec((tile_p, hid), lambda i: (i, 0)),
                       pl.BlockSpec((tile_p, hid), lambda i: (i, 0)),
                       pl.BlockSpec((1, 1, hid), lambda i: (i, 0, 0))),
            compiler_params=_vmem_params(vmem_p, ("parallel",)),
        )(a_11, adj_p, z, z_shuf, bias, mask_col)

        # --- epilogue: c = sigmoid(mean(h1)); u = (W_bil @ c)^T as bf16 -------
        u = pl.pallas_call(
            _readout_kernel,
            out_shape=jax.ShapeDtypeStruct((1, hid), jnp.bfloat16),
            in_specs=[pl.BlockSpec(memory_space=pltpu.MemorySpace.VMEM)] * 3,
            out_specs=pl.BlockSpec(memory_space=pltpu.MemorySpace.VMEM),
        )(invn_11, csum_parts, wbilt)

        # --- phase 2: stream h1/h2 back, lane-dense logits + BCE partials -----
        vmem_s = 2 * (2 * tile_a * hid * 2 + 2 * tile_a * 4) + 2 * tile_a * 4
        logits2, loss_parts = pl.pallas_call(
            _score_kernel,
            out_shape=(jax.ShapeDtypeStruct((2, n_pad), jnp.float32),
                       jax.ShapeDtypeStruct((nt_a, 1, 1), jnp.float32)),
            grid=(nt_a,),
            in_specs=[pl.BlockSpec((1, 1), lambda i: (0, 0)),           # bilinear bias
                      pl.BlockSpec((1, hid), lambda i: (0, 0)),         # u (resident)
                      pl.BlockSpec((tile_a, hid), lambda i: (i, 0)),    # h1 tile
                      pl.BlockSpec((tile_a, hid), lambda i: (i, 0)),    # h2 tile
                      pl.BlockSpec((1, tile_a), lambda i: (0, i))],     # valid mask (lanes)
            out_specs=(pl.BlockSpec((2, tile_a), lambda i: (0, i)),
                       pl.BlockSpec((1, 1, 1), lambda i: (i, 0, 0))),
            compiler_params=_vmem_params(vmem_s, ("parallel",)),
        )(bb_11, u, h1, h2, mask_row)
        loss_total = jnp.sum(loss_parts)

    # back to the PyTorch convention: logits = cat((sc_1, sc_2), dim=1) -> (1, 2N)
    logits = jnp.concatenate([logits2[0, :n], logits2[1, :n]])[None, :]
    loss = loss_total / (2.0 * n)
    return logits, loss


# ---------------------------------------------------------- pure-JAX reference
def _reference(features, adj, perm, w_gcn, b_gcn, prelu_a, w_bil, b_bil):
    shuf = features[perm, :]

    def gcn(feat):
        z = adj @ (feat @ w_gcn) + b_gcn
        return jnp.where(z > 0, z, prelu_a * z)

    h1, h2 = gcn(features), gcn(shuf)
    c = jax.nn.sigmoid(h1.mean(0))
    u = w_bil @ c
    sc1 = h1 @ u + b_bil
    sc2 = h2 @ u + b_bil
    logits = jnp.concatenate([sc1, sc2])[None, :]
    n = features.shape[0]
    y = jnp.concatenate([jnp.ones(n), jnp.zeros(n)])[None, :]
    loss = jnp.mean(jnp.maximum(logits, 0.0) - logits * y
                    + jnp.log1p(jnp.exp(-jnp.abs(logits))))
    return logits, loss


if __name__ == "__main__":
    # nodes, ft_size, hid_units.  N is deliberately NOT a tile multiple so the
    # padding / masking path is exercised; F=96 exercises the F->128 padding.
    N, F, H = 200, 96, 128

    key = jax.random.PRNGKey(0)
    k_x, k_adj, k_perm, k_w, k_b, k_bil = jax.random.split(key, 6)

    features = jax.random.normal(k_x, (N, F), jnp.float32)
    adj_raw = jax.random.uniform(k_adj, (N, N), jnp.float32)
    adj = (adj_raw + adj_raw.T) / (2.0 * N)            # dense stand-in for the sparse adj

    perm = jax.random.permutation(k_perm, N)           # corruption permutation

    w_gcn = jax.random.normal(k_w, (F, H), jnp.float32) * (1.0 / jnp.sqrt(F))
    b_gcn = jax.random.normal(k_b, (H,), jnp.float32) * 0.1
    prelu_a = 0.25                                     # nn.PReLU default
    w_bil = jax.random.normal(k_bil, (H, H), jnp.float32) * (1.0 / jnp.sqrt(H))
    b_bil = 0.05

    ref_logits, ref_loss = _reference(features, adj, perm, w_gcn, b_gcn,
                                      prelu_a, w_bil, b_bil)

    # --- fused small-graph path (the one these shapes actually select) --------
    logits, loss = dgi_forward(features, adj, perm, w_gcn, b_gcn,
                               prelu_a, w_bil, b_bil)
    jax.block_until_ready((logits, loss))
    assert logits.shape == ref_logits.shape, (logits.shape, ref_logits.shape)
    assert jnp.allclose(logits, ref_logits, rtol=5e-2, atol=1e-2), (
        "fused logits mismatch, max abs err = "
        + str(float(jnp.max(jnp.abs(logits - ref_logits)))))
    assert jnp.allclose(loss, ref_loss, rtol=2e-2, atol=5e-3), (
        "fused loss mismatch: " + str(float(loss)) + " vs " + str(float(ref_loss)))

    # --- tiled large-graph path, forced at demo scale to exercise the pipeline -
    logits_t, loss_t = dgi_forward(features, adj, perm, w_gcn, b_gcn,
                                   prelu_a, w_bil, b_bil, force_tiled=True)
    jax.block_until_ready((logits_t, loss_t))
    assert jnp.allclose(logits_t, ref_logits, rtol=5e-2, atol=1e-2), (
        "tiled logits mismatch, max abs err = "
        + str(float(jnp.max(jnp.abs(logits_t - ref_logits)))))
    assert jnp.allclose(loss_t, ref_loss, rtol=2e-2, atol=5e-3), (
        "tiled loss mismatch: " + str(float(loss_t)) + " vs " + str(float(ref_loss)))

    print("KERNEL_OK")
</pallas_src>

<mosaic_0001>
module attributes {stable_mosaic.version = 11 : i64} {
  func.func @_fused_kernel(%arg0: memref<256x128xbf16, #tpu.memory_space<vmem>>, %arg1: memref<256x128xbf16, #tpu.memory_space<vmem>>, %arg2: memref<256x256xbf16, #tpu.memory_space<vmem>>, %arg3: memref<128x128xbf16, #tpu.memory_space<vmem>>, %arg4: memref<1x128xf32, #tpu.memory_space<vmem>>, %arg5: memref<1x1xf32, #tpu.memory_space<vmem>>, %arg6: memref<128x128xf32, #tpu.memory_space<vmem>>, %arg7: memref<1x1xf32, #tpu.memory_space<vmem>>, %arg8: memref<256x1xf32, #tpu.memory_space<vmem>>, %arg9: memref<1x256xf32, #tpu.memory_space<vmem>>, %arg10: memref<1x1xf32, #tpu.memory_space<vmem>>, %arg11: memref<2x256xf32, #tpu.memory_space<vmem>>, %arg12: memref<1x1xf32, #tpu.memory_space<vmem>>) attributes {dimension_semantics = [], scalar_prefetch = 0 : i64, scratch_operands = 0 : i64, tpu.core_type = #tpu.core_type<tc>} {
    %c0 = arith.constant 0 : index
    %c0_0 = arith.constant 0 : index
    %0 = vector.load %arg5[%c0, %c0_0] : memref<1x1xf32, #tpu.memory_space<vmem>>, vector<1x1xf32>
    %c0_1 = arith.constant 0 : index
    %c0_2 = arith.constant 0 : index
    %1 = vector.load %arg3[%c0_1, %c0_2] : memref<128x128xbf16, #tpu.memory_space<vmem>>, vector<128x128xbf16>
    %c0_3 = arith.constant 0 : index
    %c0_4 = arith.constant 0 : index
    %2 = vector.load %arg0[%c0_3, %c0_4] : memref<256x128xbf16, #tpu.memory_space<vmem>>, vector<256x128xbf16>
    %cst = arith.constant dense<0.000000e+00> : vector<256x128xf32>
    %3 = tpu.matmul %2, %1, %cst {dimension_numbers = #tpu.dot_dimension_numbers<[1], [0], [0], [1], [0, 0, 1, 1], [], []>} : vector<256x128xbf16>, vector<128x128xbf16>, vector<256x128xf32> -> vector<256x128xf32>
    %4 = arith.truncf %3 : vector<256x128xf32> to vector<256x128xbf16>
    %c0_5 = arith.constant 0 : index
    %c0_6 = arith.constant 0 : index
    %5 = vector.load %arg1[%c0_5, %c0_6] : memref<256x128xbf16, #tpu.memory_space<vmem>>, vector<256x128xbf16>
    %cst_7 = arith.constant dense<0.000000e+00> : vector<256x128xf32>
    %6 = tpu.matmul %5, %1, %cst_7 {dimension_numbers = #tpu.dot_dimension_numbers<[1], [0], [0], [1], [0, 0, 1, 1], [], []>} : vector<256x128xbf16>, vector<128x128xbf16>, vector<256x128xf32> -> vector<256x128xf32>
    %7 = arith.truncf %6 : vector<256x128xf32> to vector<256x128xbf16>
    %c0_8 = arith.constant 0 : index
    %c0_9 = arith.constant 0 : index
    %8 = vector.load %arg2[%c0_8, %c0_9] : memref<256x256xbf16, #tpu.memory_space<vmem>>, vector<256x256xbf16>
    %c0_10 = arith.constant 0 : index
    %c0_11 = arith.constant 0 : index
    %9 = vector.load %arg4[%c0_10, %c0_11] : memref<1x128xf32, #tpu.memory_space<vmem>>, vector<1x128xf32>
    %cst_12 = arith.constant dense<0.000000e+00> : vector<256x128xf32>
    %10 = tpu.matmul %8, %4, %cst_12 {dimension_numbers = #tpu.dot_dimension_numbers<[1], [0], [0], [1], [0, 0, 1, 1], [], []>} : vector<256x256xbf16>, vector<256x128xbf16>, vector<256x128xf32> -> vector<256x128xf32>
    %11 = vector.broadcast %9 : vector<1x128xf32> to vector<256x128xf32>
    %12 = arith.addf %10, %11 : vector<256x128xf32>
    %cst_13 = arith.constant dense<0.000000e+00> : vector<256x128xf32>
    %13 = tpu.matmul %8, %7, %cst_13 {dimension_numbers = #tpu.dot_dimension_numbers<[1], [0], [0], [1], [0, 0, 1, 1], [], []>} : vector<256x256xbf16>, vector<256x128xbf16>, vector<256x128xf32> -> vector<256x128xf32>
    %14 = vector.broadcast %9 : vector<1x128xf32> to vector<256x128xf32>
    %15 = arith.addf %13, %14 : vector<256x128xf32>
    %cst_14 = arith.constant 0.000000e+00 : f32
    %16 = vector.broadcast %cst_14 : f32 to vector<256x128xf32>
    %17 = arith.cmpf ogt, %12, %16 : vector<256x128xf32>
    %18 = vector.broadcast %0 : vector<1x1xf32> to vector<256x128xf32>
    %19 = arith.mulf %18, %12 : vector<256x128xf32>
    %20 = arith.select %17, %12, %19 : vector<256x128xi1>, vector<256x128xf32>
    %cst_15 = arith.constant 0.000000e+00 : f32
    %21 = vector.broadcast %cst_15 : f32 to vector<256x128xf32>
    %22 = arith.cmpf ogt, %15, %21 : vector<256x128xf32>
    %23 = vector.broadcast %0 : vector<1x1xf32> to vector<256x128xf32>
    %24 = arith.mulf %23, %15 : vector<256x128xf32>
    %25 = arith.select %22, %15, %24 : vector<256x128xi1>, vector<256x128xf32>
    %c0_16 = arith.constant 0 : index
    %c0_17 = arith.constant 0 : index
    %26 = vector.load %arg8[%c0_16, %c0_17] : memref<256x1xf32, #tpu.memory_space<vmem>>, vector<256x1xf32>
    %27 = vector.broadcast %26 : vector<256x1xf32> to vector<256x128xf32>
    %28 = arith.mulf %20, %27 : vector<256x128xf32>
    %cst_18 = arith.constant dense<0.000000e+00> : vector<128xf32>
    %29 = vector.multi_reduction <add>, %28, %cst_18 [0] : vector<256x128xf32> to vector<128xf32>
    %30 = vector.shape_cast %29 : vector<128xf32> to vector<1x128xf32>
    %c0_19 = arith.constant 0 : index
    %c0_20 = arith.constant 0 : index
    %31 = vector.load %arg10[%c0_19, %c0_20] : memref<1x1xf32, #tpu.memory_space<vmem>>, vector<1x1xf32>
    %32 = vector.broadcast %31 : vector<1x1xf32> to vector<1x128xf32>
    %33 = arith.mulf %30, %32 : vector<1x128xf32>
    %34 = arith.negf %33 : vector<1x128xf32>
    %35 = math.exp %34 : vector<1x128xf32>
    %cst_21 = arith.constant 1.000000e+00 : f32
    %36 = vector.broadcast %cst_21 : f32 to vector<1x128xf32>
    %37 = arith.addf %36, %35 : vector<1x128xf32>
    %38 = arith.divf %36, %37 : vector<1x128xf32>
    %c0_22 = arith.constant 0 : index
    %c0_23 = arith.constant 0 : index
    %39 = vector.load %arg6[%c0_22, %c0_23] : memref<128x128xf32, #tpu.memory_space<vmem>>, vector<128x128xf32>
    %cst_24 = arith.constant dense<0.000000e+00> : vector<1x128xf32>
    %40 = tpu.matmul %38, %39, %cst_24 {dimension_numbers = #tpu.dot_dimension_numbers<[1], [0], [0], [1], [0, 0, 1, 1], [], []>} : vector<1x128xf32>, vector<128x128xf32>, vector<1x128xf32> -> vector<1x128xf32>
    %41 = arith.truncf %40 : vector<1x128xf32> to vector<1x128xbf16>
    %42 = arith.truncf %20 : vector<256x128xf32> to vector<256x128xbf16>
    %cst_25 = arith.constant dense<0.000000e+00> : vector<1x256xf32>
    %43 = tpu.matmul %41, %42, %cst_25 {dimension_numbers = #tpu.dot_dimension_numbers<[1], [1], [0], [0], [0, 0, 1, 0], [], []>} : vector<1x128xbf16>, vector<256x128xbf16>, vector<1x256xf32> -> vector<1x256xf32>
    %c0_26 = arith.constant 0 : index
    %c0_27 = arith.constant 0 : index
    %44 = vector.load %arg7[%c0_26, %c0_27] : memref<1x1xf32, #tpu.memory_space<vmem>>, vector<1x1xf32>
    %45 = vector.broadcast %44 : vector<1x1xf32> to vector<1x256xf32>
    %46 = arith.addf %43, %45 : vector<1x256xf32>
    %47 = arith.truncf %25 : vector<256x128xf32> to vector<256x128xbf16>
    %cst_28 = arith.constant dense<0.000000e+00> : vector<1x256xf32>
    %48 = tpu.matmul %41, %47, %cst_28 {dimension_numbers = #tpu.dot_dimension_numbers<[1], [1], [0], [0], [0, 0, 1, 0], [], []>} : vector<1x128xbf16>, vector<256x128xbf16>, vector<1x256xf32> -> vector<1x256xf32>
    %c0_29 = arith.constant 0 : index
    %c0_30 = arith.constant 0 : index
    %49 = vector.load %arg7[%c0_29, %c0_30] : memref<1x1xf32, #tpu.memory_space<vmem>>, vector<1x1xf32>
    %50 = vector.broadcast %49 : vector<1x1xf32> to vector<1x256xf32>
    %51 = arith.addf %48, %50 : vector<1x256xf32>
    %52 = tpu.concatenate %46, %51 in 0 : vector<1x256xf32>, vector<1x256xf32> -> vector<2x256xf32>
    %c0_31 = arith.constant 0 : index
    %c0_32 = arith.constant 0 : index
    %53 = vector.load %arg11[%c0_31, %c0_32] : memref<2x256xf32, #tpu.memory_space<vmem>>, vector<2x256xf32>
    tpu.vector_store %arg11[%c0_31, %c0_32], %52 {strides = array<i32>} : memref<2x256xf32, #tpu.memory_space<vmem>>, vector<2x256xf32>,
    %54 = tpu.iota {dimensions = array<i32: 0>} : vector<2x1xi32>
    %c0_i32 = arith.constant 0 : i32
    %55 = vector.broadcast %c0_i32 : i32 to vector<2x1xi32>
    %56 = arith.cmpi eq, %54, %55 : vector<2x1xi32>
    %57 = arith.extui %56 : vector<2x1xi1> to vector<2x1xi32>
    %58 = arith.sitofp %57 : vector<2x1xi32> to vector<2x1xf32>
    %cst_33 = arith.constant 0.000000e+00 : f32
    %59 = vector.broadcast %cst_33 : f32 to vector<2x256xf32>
    %60 = arith.maximumf %52, %59 : vector<2x256xf32>
    %61 = vector.broadcast %58 : vector<2x1xf32> to vector<2x256xf32>
    %62 = arith.mulf %52, %61 : vector<2x256xf32>
    %63 = arith.subf %60, %62 : vector<2x256xf32>
    %64 = math.absf %52 : vector<2x256xf32>
    %cst_34 = arith.constant 0.000000e+00 : f32
    %65 = vector.broadcast %cst_34 : f32 to vector<2x256xf32>
    %66 = arith.subf %65, %64 : vector<2x256xf32>
    %67 = math.exp %66 : vector<2x256xf32>
    %68 = math.log1p %67 : vector<2x256xf32>
    %69 = arith.addf %63, %68 : vector<2x256xf32>
    %c0_35 = arith.constant 0 : index
    %c0_36 = arith.constant 0 : index
    %70 = vector.load %arg9[%c0_35, %c0_36] : memref<1x256xf32, #tpu.memory_space<vmem>>, vector<1x256xf32>
    %71 = vector.broadcast %70 : vector<1x256xf32> to vector<2x256xf32>
    %72 = arith.mulf %69, %71 : vector<2x256xf32>
    %cst_37 = arith.constant dense<0.000000e+00> : vector<2xf32>
    %73 = vector.multi_reduction <add>, %72, %cst_37 [1] : vector<2x256xf32> to vector<2xf32>
    %74 = vector.shape_cast %73 : vector<2xf32> to vector<2x1xf32>
    %cst_38 = arith.constant dense<0.000000e+00> : vector<1xf32>
    %75 = vector.multi_reduction <add>, %74, %cst_38 [0] : vector<2x1xf32> to vector<1xf32>
    %76 = vector.shape_cast %75 : vector<1xf32> to vector<1x1xf32>
    %c0_39 = arith.constant 0 : index
    %c0_40 = arith.constant 0 : index
    %77 = vector.load %arg12[%c0_39, %c0_40] : memref<1x1xf32, #tpu.memory_space<vmem>>, vector<1x1xf32>
    tpu.vector_store %arg12[%c0_39, %c0_40], %76 {strides = array<i32>} : memref<1x1xf32, #tpu.memory_space<vmem>>, vector<1x1xf32>,
    return
  }
}

</mosaic_0001>

<bundles_post_ra>
// kernel: dgi_forward.1
= control target key start
LH: loop header
LB: loop body
LE: loop exit
PB: predicated region body
PF: predicated region fallthrough
CT: control target
= control target key end

     0   :  { %s3769_s0 = inlined_call_operand.vmem [shape: bf16[256,128], index: 0, kind: input, shape index: {}]   ;;  %s3770_s1 = inlined_call_operand.vmem [shape: bf16[256,128], index: 1, kind: input, shape index: {}]   ;;  %s3771_s2 = inlined_call_operand.vmem [shape: bf16[256,256], index: 2, kind: input, shape index: {}]   ;;  %s3772_s3 = inlined_call_operand.vmem [shape: bf16[128,128], index: 3, kind: input, shape index: {}]   ;;  %s3773_s4 = inlined_call_operand.vmem [shape: f32[1,128], index: 4, kind: input, shape index: {}]   ;;  %s3774_s5 = inlined_call_operand.<no memory space> [shape: f32[1,1], index: 5, kind: input, shape index: {}]   ;;  %s3775_s6 = inlined_call_operand.vmem [shape: f32[128,128], index: 6, kind: input, shape index: {}]   ;;  %s3776_s8 = inlined_call_operand.vmem [shape: f32[256,1], index: 8, kind: input, shape index: {}]   ;;  %s3777_s9 = inlined_call_operand.vmem [shape: f32[1,256], index: 9, kind: input, shape index: {}]   ;;  %s3778_s11 = inlined_call_operand.vmem [shape: f32[2,256], index: 11, kind: output, shape index: {0}]   ;;  %s3779_s12 = inlined_call_operand.hbm [shape: f32[1,1], index: 12, kind: output, shape index: {1}]   ;;  %s3780_s7 = inlined_call_operand.<no memory space> [shape: f32[1,1], index: 7, kind: input, shape index: {}]   ;;  %s3781_s10 = inlined_call_operand.<no memory space> [shape: f32[1,1], index: 10, kind: input, shape index: {}]  }
   0x1   :  { %v18_v0 = vstv %s3774_s5  ;;  %v20_v1 = vstv %s3780_s7  ;;  %v22_v2 = vstv %s3781_s10 }
   0x2   :  { %19 = vst [vmem:[#allocation2] sm:$0x1] %v18_v0  ;;  %21 = vst [vmem:[#allocation3] sm:$0x1] %v20_v1 }
   0x3   :  { %23 = vst [vmem:[#allocation4] sm:$0x1] %v22_v2 }
   0x4   :  { %v2596_v3 = vld [vmem:[%s3772_s3 + $0x38] sm:$0xff]   ;;  %v2597_v4 = vld [vmem:[%s3772_s3 + $0x30] sm:$0xff]   ;;  %v2598_v5 = vld [vmem:[%s3772_s3 + $0x28] sm:$0xff]  }
   0x5   :  { %2443 = vmatprep.subr.bf16.mxu0 %v2596_v3  ;;  %2574 = vmatprep.subr.bf16.mxu1 %v2596_v3  ;;  %v2599_v6 = vld [vmem:[%s3772_s3 + $0x20] sm:$0xff]   ;;  %v2600_v9 = vld [vmem:[%s3772_s3 + $0x18] sm:$0xff]   ;;  %v2601_v10 = vld [vmem:[%s3772_s3 + $0x10] sm:$0xff]  }
   0x6   :  { %2444 = vmatpush3.bf16.msra.mxu0 %v2596_v3  ;;  %2582 = vmatpush3.bf16.msra.mxu1 %v2596_v3  ;;  %v2604_v7 = vld [vmem:[%s3769_s0] sm:$0xff]   ;;  %v2602_v11 = vld [vmem:[%s3772_s3 + $0x8] sm:$0xff]   ;;  %v2608_v15 = vld [vmem:[%s3769_s0 + $0x10] sm:$0xff]  }
   0x7   :  { %2445 = vmatprep.subr.bf16.mxu0 %v2597_v4  ;;  %2575 = vmatprep.subr.bf16.mxu1 %v2597_v4  ;;  %v2605_v8 = vld [vmem:[%s3769_s0 + $0x40] sm:$0xff]   ;;  %v2606_v13 = vld [vmem:[%s3769_s0 + $0x8] sm:$0xff]   ;;  %v2609_v16 = vld [vmem:[%s3769_s0 + $0x50] sm:$0xff]  }
   0x8   :  { %2459 = vmatprep.mubr.bf16.mxu0 %v2604_v7  ;;  %2475 = vmatprep.mubr.bf16.mxu1 %v2605_v8  ;;  %v2603_v12 = vld [vmem:[%s3772_s3] sm:$0xff]   ;;  %v2607_v14 = vld [vmem:[%s3769_s0 + $0x48] sm:$0xff]   ;;  %v2610_v17 = vld [vmem:[%s3769_s0 + $0x18] sm:$0xff]  }
   0x9   :  { %v2611_v18 = vld [vmem:[%s3769_s0 + $0x58] sm:$0xff]   ;;  %v2612_v19 = vld [vmem:[%s3769_s0 + $0x20] sm:$0xff]   ;;  %v2614_v21 = vld [vmem:[%s3769_s0 + $0x28] sm:$0xff]  }
   0xa   :  { %2446 = vmatpush3.bf16.msra.mxu0 %v2597_v4  ;;  %2583 = vmatpush3.bf16.msra.mxu1 %v2597_v4  ;;  %v2613_v20 = vld [vmem:[%s3769_s0 + $0x60] sm:$0xff]   ;;  %v2615_v22 = vld [vmem:[%s3769_s0 + $0x68] sm:$0xff]   ;;  %v2616_v23 = vld [vmem:[%s3769_s0 + $0x30] sm:$0xff]  }
   0xb   :  { %2447 = vmatprep.subr.bf16.mxu0 %v2598_v5  ;;  %2576 = vmatprep.subr.bf16.mxu1 %v2598_v5  ;;  %v2617_v24 = vld [vmem:[%s3769_s0 + $0x70] sm:$0xff]  }
   0xe   :  { %2448 = vmatpush3.bf16.msra.mxu0 %v2598_v5  ;;  %2584 = vmatpush3.bf16.msra.mxu1 %v2598_v5 }
   0xf   :  { %2449 = vmatprep.subr.bf16.mxu0 %v2599_v6  ;;  %2577 = vmatprep.subr.bf16.mxu1 %v2599_v6 }
  0x12   :  { %2450 = vmatpush3.bf16.msra.mxu0 %v2599_v6  ;;  %2585 = vmatpush3.bf16.msra.mxu1 %v2599_v6 }
  0x13   :  { %2451 = vmatprep.subr.bf16.mxu0 %v2600_v9  ;;  %2578 = vmatprep.subr.bf16.mxu1 %v2600_v9 }
  0x16   :  { %2452 = vmatpush3.bf16.msra.mxu0 %v2600_v9  ;;  %2586 = vmatpush3.bf16.msra.mxu1 %v2600_v9 }
  0x17   :  { %2453 = vmatprep.subr.bf16.mxu0 %v2601_v10  ;;  %2579 = vmatprep.subr.bf16.mxu1 %v2601_v10 }
  0x1a   :  { %2454 = vmatpush3.bf16.msra.mxu0 %v2601_v10  ;;  %2587 = vmatpush3.bf16.msra.mxu1 %v2601_v10 }
  0x1b   :  { %2455 = vmatprep.subr.bf16.mxu0 %v2602_v11  ;;  %2580 = vmatprep.subr.bf16.mxu1 %v2602_v11 }
  0x1e   :  { %2456 = vmatpush3.bf16.msra.mxu0 %v2602_v11  ;;  %2588 = vmatpush3.bf16.msra.mxu1 %v2602_v11 }
  0x1f   :  { %2457 = vmatprep.subr.bf16.mxu0 %v2603_v12  ;;  %2581 = vmatprep.subr.bf16.mxu1 %v2603_v12 }
  0x22   :  { %2458 = vmatpush3.bf16.msra.mxu0 %v2603_v12  ;;  %2589 = vmatpush3.bf16.msra.mxu1 %v2603_v12 }
  0x23   :  { %2491 = vmatprep.subr.bf16.mxu1 %v2596_v3 }
  0x25   :  { %2460 = vmatmul.mubr.bf16.vlgmr.msra.gmra.mxu0 %v2606_v13  ;;  %2476 = vmatmul.mubr.bf16.vlgmr.msra.gmra.mxu1 %v2607_v14 }
  0x26   :  { %2492 = vmatpush3.bf16.msra.mxu1 %v2596_v3  ;;  %2463 = vmatprep.mubr.bf16.mxu0 %v2608_v15 }
  0x27   :  { %2493 = vmatprep.subr.bf16.mxu1 %v2597_v4  ;;  %2479 = vmatprep.mubr.bf16.mxu1 %v2609_v16 }
  0x2a   :  { %2494 = vmatpush3.bf16.msra.mxu1 %v2597_v4 }
  0x2b   :  { %2495 = vmatprep.subr.bf16.mxu1 %v2598_v5 }
  0x2d   :  { %2464 = vmatmul.mubr.bf16.gmra.mxu0 %v2610_v17  ;;  %2480 = vmatmul.mubr.bf16.gmra.mxu1 %v2611_v18 }
  0x2e   :  { %2496 = vmatpush3.bf16.msra.mxu1 %v2598_v5  ;;  %2467 = vmatprep.mubr.bf16.mxu0 %v2612_v19 }
  0x2f   :  { %2497 = vmatprep.subr.bf16.mxu1 %v2599_v6  ;;  %2483 = vmatprep.mubr.bf16.mxu1 %v2613_v20 }
  0x32   :  { %2498 = vmatpush3.bf16.msra.mxu1 %v2599_v6 }
  0x33   :  { %2499 = vmatprep.subr.bf16.mxu1 %v2600_v9 }
  0x35   :  { %2468 = vmatmul.mubr.bf16.gmra.mxu0 %v2614_v21  ;;  %2484 = vmatmul.mubr.bf16.gmra.mxu1 %v2615_v22 }
  0x36   :  { %24 = vsyncpa [#allocation6], 0  ;;  %2500 = vmatpush3.bf16.msra.mxu1 %v2600_v9  ;;  %2471 = vmatprep.mubr.bf16.mxu0 %v2616_v23  ;;  %v2618_v25 = vld [vmem:[%s3769_s0 + $0x38] sm:$0xff]   ;;  %v2620_v27 = vld [vmem:[%s3770_s1] sm:$0xff]   ;;  %v2719_v46 = vmov 0   ;;  %vm2721_vm10 = vmmov 0  }
  0x37   :  { %2501 = vmatprep.subr.bf16.mxu1 %v2601_v10  ;;  %2487 = vmatprep.mubr.bf16.mxu1 %v2617_v24  ;;  %v2619_v26 = vld [vmem:[%s3769_s0 + $0x78] sm:$0xff]   ;;  %v2621_v28 = vld [vmem:[%s3770_s1 + $0x8] sm:$0xff]   ;;  %v2622_v29 = vld [vmem:[%s3770_s1 + $0x10] sm:$0xff]  }
  0x38   :  { %v2623_v30 = vld [vmem:[%s3770_s1 + $0x18] sm:$0xff]   ;;  %v2624_v31 = vld [vmem:[%s3770_s1 + $0x20] sm:$0xff]   ;;  %v2625_v32 = vld [vmem:[%s3770_s1 + $0x28] sm:$0xff]   ;;  %2594 = vset.pattern.permute.xlu0 %v2719_v46  ;;  %2595 = vset.pattern.permute.xlu1 %v2719_v46 }
  0x39   :  { %v2626_v33 = vld [vmem:[%s3770_s1 + $0x30] sm:$0xff]   ;;  %v2627_v34 = vld [vmem:[%s3770_s1 + $0x38] sm:$0xff]   ;;  %v2628_v35 = vld [vmem:[%s3770_s1 + $0x40] sm:$0xff]  }
  0x3a   :  { %2502 = vmatpush3.bf16.msra.mxu1 %v2601_v10  ;;  %v2629_v36 = vld [vmem:[%s3770_s1 + $0x48] sm:$0xff]   ;;  %v2630_v37 = vld [vmem:[%s3770_s1 + $0x50] sm:$0xff]   ;;  %v2631_v38 = vld [vmem:[%s3770_s1 + $0x58] sm:$0xff]  }
  0x3b   :  { %2503 = vmatprep.subr.bf16.mxu1 %v2602_v11  ;;  %v2632_v39 = vld [vmem:[%s3770_s1 + $0x60] sm:$0xff]   ;;  %v2633_v40 = vld [vmem:[%s3770_s1 + $0x68] sm:$0xff]   ;;  %v2634_v41 = vld [vmem:[%s3770_s1 + $0x70] sm:$0xff]  }
  0x3c   :  { %v2635_v42 = vld [vmem:[%s3770_s1 + $0x78] sm:$0xff]   ;;  %v2638_v43 = vld [vmem:[%s3771_s2 + $0x4] ss:$8 sps:$4 sm:$0xff]   ;;  %v2114_v47 = vld [vmem:[#allocation2] ss:$0 sm:$0xff] }
  0x3d   :  { %2472 = vmatmul.mubr.bf16.gmra.mxu0 %v2618_v25  ;;  %2488 = vmatmul.mubr.bf16.gmra.mxu1 %v2619_v26  ;;  %v1445_v54 = vld [vmem:[%s3776_s8] sm:$0xff]  ;;  %v1446_v55 = vld [vmem:[%s3776_s8 + $0x8] sm:$0xff]  ;;  %v1448_v58 = vld [vmem:[%s3776_s8 + $0x18] sm:$0xff] }
  0x3e   :  { %2504 = vmatpush3.bf16.msra.mxu1 %v2602_v11  ;;  %2507 = vmatprep.mubr.bf16.mxu1 %v2620_v27  ;;  %v1447_v1 = vld [vmem:[%s3776_s8 + $0x10] sm:$0xff]  ;;  %v1450_v2 = vld [vmem:[%s3776_s8 + $0x28] sm:$0xff]  ;;  %v1449_v5 = vld [vmem:[%s3776_s8 + $0x20] sm:$0xff] }
  0x3f   :  { %2505 = vmatprep.subr.bf16.mxu1 %v2603_v12  ;;  %954 = vmatprep.mubr.bf16.mxu0 %v2638_v43  ;;  %v1452_v6 = vld [vmem:[%s3776_s8 + $0x38] sm:$0xff]  ;;  %v1451_v13 = vld [vmem:[%s3776_s8 + $0x30] sm:$0xff]  ;;  %v1454_v14 = vld [vmem:[%s3776_s8 + $0x48] sm:$0xff] }
  0x40   :  { %1282 = vperm.xlu0 %2594, %v2114_v47   ;;  %1484 = vperm.xlu1 %2595, %v1446_v55   ;;  %v1453_v17 = vld [vmem:[%s3776_s8 + $0x40] sm:$0xff]  ;;  %v1456_v18 = vld [vmem:[%s3776_s8 + $0x58] sm:$0xff]  ;;  %v1455_v26 = vld [vmem:[%s3776_s8 + $0x50] sm:$0xff] }
  0x41   :  { %v1461_v47 = vld [vmem:[%s3776_s8 + $0x80] sm:$0xff] }
  0x42   :  { %2506 = vmatpush3.bf16.msra.mxu1 %v2603_v12 }
  0x44   :  { %1479 = vperm.xlu0 %2594, %v1445_v54   ;;  %1489 = vperm.xlu1 %2595, %v1447_v1   ;;  %v1464_v54 = vld [vmem:[%s3776_s8 + $0x98] sm:$0xff] }
  0x45   :  { %2508 = vmatmul.mubr.bf16.vlgmr.msra.gmra.mxu1 %v2621_v28 }
  0x46   :  { %2511 = vmatprep.mubr.bf16.mxu1 %v2622_v29  ;;  %v1458_v29 = vld [vmem:[%s3776_s8 + $0x68] sm:$0xff] }
  0x48   :  { %1494 = vperm.xlu0 %2594, %v1448_v58   ;;  %1499 = vperm.xlu1 %2595, %v1449_v5  }
  0x4c   :  { %1504 = vperm.xlu0 %2594, %v1450_v2   ;;  %1509 = vperm.xlu1 %2595, %v1451_v13   ;;  %v3091_v13 = vld [vmem:[%s3771_s2] ss:$8 sps:$4 sm:$0xff]  }
  0x4d   :  { %2512 = vmatmul.mubr.bf16.gmra.mxu1 %v2623_v30 }
  0x4e   :  { %2515 = vmatprep.mubr.bf16.mxu1 %v2624_v31  ;;  %v1457_v31 = vld [vmem:[%s3776_s8 + $0x60] sm:$0xff] }
  0x50   :  { %1514 = vperm.xlu0 %2594, %v1452_v6   ;;  %1519 = vperm.xlu1 %2595, %v1453_v17   ;;  %v1463_v6 = vld [vmem:[%s3776_s8 + $0x90] sm:$0xff] }
  0x54   :  { %1524 = vperm.xlu0 %2594, %v1454_v14   ;;  %1529 = vperm.xlu1 %2595, %v1455_v26   ;;  %v1826_v26 = vld [vmem:[#allocation3] sm:$0x1] }
  0x55   :  { %2516 = vmatmul.mubr.bf16.gmra.mxu1 %v2625_v32  ;;  %v1460_v32 = vld [vmem:[%s3776_s8 + $0x78] sm:$0xff] }
  0x56   :  { %2519 = vmatprep.mubr.bf16.mxu1 %v2626_v33 }
  0x58   :  { %1534 = vperm.xlu0 %2594, %v1456_v18   ;;  %1539 = vperm.xlu1 %2595, %v1457_v31   ;;  %v1473_v18 = vld [vmem:[%s3776_s8 + $0xe0] sm:$0xff] }
  0x59   :  { %v3138_v31 = vld [vmem:[%s3771_s2 + $0x20] ss:$8 sps:$4 sm:$0xff]  }
  0x5c   :  { %1544 = vperm.xlu0 %2594, %v1458_v29  }
  0x5d   :  { %2520 = vmatmul.mubr.bf16.gmra.mxu1 %v2627_v34 }
  0x5e   :  { %2523 = vmatprep.mubr.bf16.mxu1 %v2628_v35 }
  0x60   :  { %1554 = vperm.xlu0 %2594, %v1460_v32  }
  0x65   :  { %2524 = vmatmul.mubr.bf16.gmra.mxu1 %v2629_v36 }
  0x66   :  { %2527 = vmatprep.mubr.bf16.mxu1 %v2630_v37 }
  0x6d   :  { %2528 = vmatmul.mubr.bf16.gmra.mxu1 %v2631_v38 }
  0x6e   :  { %2531 = vmatprep.mubr.bf16.mxu1 %v2632_v39 }
  0x75   :  { %2532 = vmatmul.mubr.bf16.gmra.mxu1 %v2633_v40  ;;  %v1459_v40 = vld [vmem:[%s3776_s8 + $0x70] sm:$0xff] }
  0x76   :  { %2535 = vmatprep.mubr.bf16.mxu1 %v2634_v41  ;;  %1549 = vperm.xlu1 %2595, %v1459_v40  }
  0x7a   :  { %1559 = vperm.xlu1 %2595, %v1461_v47   ;;  %v3155_v47 = vld [vmem:[%s3771_s2 + $0x44] ss:$8 sps:$4 sm:$0xff]  }
  0x7d   :  { %2536 = vmatmul.mubr.bf16.gmra.mxu1 %v2635_v42 }
  0x7e   :  { %1115 = vmatprep.mubr.bf16.mxu1 %v2638_v43  ;;  %v1462_v43 = vld [vmem:[%s3776_s8 + $0x88] sm:$0xff]  ;;  %1569 = vperm.xlu1 %2595, %v1463_v6  }
  0x7f   :  { %1564 = vperm.xlu0 %2594, %v1462_v43  }
  0x83   :  { %1574 = vperm.xlu0 %2594, %v1464_v54  }
  0xe5   :  { %v2920_v44 = vpop.f32.mrf.mxu0  ;;  %v2922_v45 = vpop.f32.mrf.mxu1 }
  0xe7   :  { %v2924_v48 = vpop.f32.mrf.mxu0  ;;  %v2926_v49 = vpop.f32.mrf.mxu1 }
  0xe9   :  { %v2928_v50 = vpop.f32.mrf.mxu0  ;;  %v2930_v51 = vpop.f32.mrf.mxu1 }
  0xeb   :  { %v2932_v52 = vpop.f32.mrf.mxu0  ;;  %v2934_v53 = vpop.f32.mrf.mxu1 }
  0xed   :  { %v2942_v56 = vpop.f32.mrf.mxu0  ;;  %v2944_v57 = vpop.f32.mrf.mxu1 }
  0xef   :  { %v2949_v59 = vpop.f32.mrf.mxu0  ;;  %v2951_v60 = vpop.f32.mrf.mxu1 }
  0xf1   :  { %v2953_v61 = vpop.f32.mrf.mxu0  ;;  %v2955_v62 = vpop.f32.mrf.mxu1 }
  0xf2   :  { %v413_v1 = vpack.c.bf16 %v2955_v62, %v2944_v57 }
  0xf3   :  { %v2957_v63 = vpop.f32.mrf.mxu0  ;;  %v2959_v0 = vpop.f32.mrf.mxu1 }
  0xf4   :  { %v412_v57 = vpack.c.bf16 %v2959_v0, %v2951_v60  ;;  %v1468_v60 = vld [vmem:[%s3776_s8 + $0xb8] sm:$0xff] }
  0xf5   :  { %v2469_v3 = vpop.f32.mrf.mxu0  ;;  %v2485_v4 = vpop.f32.mrf.mxu1 }
  0xf7   :  { %v2973_v7 = vpop.f32.mrf.mxu0  ;;  %v371_v8 = vpop.f32.mrf.mxu1 }
  0xf9   :  { %v2470_v9 = vpop.f32.mrf.mxu0  ;;  %v2486_v10 = vpop.f32.mrf.mxu1 }
  0xfa   :  { %v415_v35 = vpack.c.bf16 %v2486_v10, %v2485_v4  ;;  %v407_v38 = vpack.c.bf16 %v2470_v9, %v2469_v3  ;;  %v405_v4 = vpack.c.bf16 %v2953_v61, %v2942_v56  ;;  %v1465_v56 = vld [vmem:[%s3776_s8 + $0xa0] sm:$0xff]  ;;  %v404_v61 = vpack.c.bf16 %v2957_v63, %v2949_v59  ;;  %v1467_v59 = vld [vmem:[%s3776_s8 + $0xb0] sm:$0xff] }
  0xfb   :  { %v310_v11 = vpop.f32.mrf.mxu0  ;;  %v374_v12 = vpop.f32.mrf.mxu1  ;;  %v411_v9 = vpack.c.bf16 %v2930_v51, %v2922_v45  ;;  %1579 = vperm.xlu1 %2595, %v1465_v56   ;;  %v410_v63 = vpack.c.bf16 %v2934_v53, %v2926_v49  ;;  %v1470_v45 = vld [vmem:[%s3776_s8 + $0xc8] sm:$0xff]  ;;  %v402_v49 = vpack.c.bf16 %v2932_v52, %v2924_v48  ;;  %v1471_v48 = vld [vmem:[%s3776_s8 + $0xd0] sm:$0xff] }
  0xfc   :  { %v414_v41 = vpack.c.bf16 %v374_v12, %v371_v8  ;;  %v406_v55 = vpack.c.bf16 %v310_v11, %v2973_v7  ;;  %v1466_v7 = vld [vmem:[%s3776_s8 + $0xa8] sm:$0xff]  ;;  %v403_v11 = vpack.c.bf16 %v2928_v50, %v2920_v44  ;;  %v1469_v44 = vld [vmem:[%s3776_s8 + $0xc0] sm:$0xff]  ;;  %v1472_v50 = vld [vmem:[%s3776_s8 + $0xd8] sm:$0xff] }
  0xfd   :  { %v2473_v15 = vpop.f32.mrf.mxu0  ;;  %v2489_v16 = vpop.f32.mrf.mxu1  ;;  %1584 = vperm.xlu0 %2594, %v1466_v7   ;;  %v1474_v52 = vld [vmem:[%s3776_s8 + $0xe8] sm:$0xff]  ;;  %v3168_v7 = vld [vmem:[%s3771_s2 + $0x54] ss:$8 sps:$4 sm:$0xff]  }
  0xff   :  { %v323_v19 = vpop.f32.mrf.mxu0  ;;  %v387_v20 = vpop.f32.mrf.mxu1  ;;  %1589 = vperm.xlu1 %2595, %v1467_v59   ;;  %v3176_v59 = vld [vmem:[%s3771_s2 + $0x50] ss:$8 sps:$4 sm:$0xff]  }
 0x101   :  { %v2474_v21 = vpop.f32.mrf.mxu0  ;;  %v2490_v22 = vpop.f32.mrf.mxu1  ;;  %1594 = vperm.xlu0 %2594, %v1468_v60  }
 0x102   :  { %v409_v23 = vpack.c.bf16 %v2474_v21, %v2473_v15  ;;  %v417_v24 = vpack.c.bf16 %v2490_v22, %v2489_v16  ;;  %v3096_v15 = vld [vmem:[%s3771_s2 + $0x14] ss:$8 sps:$4 sm:$0xff]   ;;  %v3119_v21 = vld [vmem:[%s3771_s2 + $0x10] ss:$8 sps:$4 sm:$0xff]  }
 0x103   :  { %v390_v25 = vpop.f32.mrf.mxu1  ;;  %v326_v27 = vpop.f32.mrf.mxu0  ;;  %1599 = vperm.xlu1 %2595, %v1469_v44  }
 0x104   :  { %v416_v28 = vpack.c.bf16 %v390_v25, %v387_v20  ;;  %2166 = vmatprep.subr.bf16.mxu0 %v417_v24  ;;  %v408_v33 = vpack.c.bf16 %v326_v27, %v323_v19  ;;  %v1476_v19 = vld [vmem:[%s3776_s8 + $0xf8] sm:$0xff]  ;;  %v1475_v25 = vld [vmem:[%s3776_s8 + $0xf0] sm:$0xff] }
 0x105   :  { %v2993_v30 = vpop.f32.mrf.mxu1  ;;  %2167 = vmatpush3.bf16.msra.mxu0 %v409_v23  ;;  %1604 = vperm.xlu0 %2594, %v1470_v45   ;;  %v3126_v23 = vld [vmem:[%s3771_s2 + $0x24] ss:$8 sps:$4 sm:$0xff]  }
 0x106   :  { %2168 = vmatprep.subr.bf16.mxu0 %v416_v28  ;;  %v1706_v28 = vld [vmem:[#allocation4] sm:$0x1]  ;;  %v3183_v45 = vld [vmem:[%s3771_s2 + $0x64] ss:$8 sps:$4 sm:$0xff]  }
 0x107   :  { %v3001_v34 = vpop.f32.mrf.mxu1  ;;  %1609 = vperm.xlu1 %2595, %v1471_v48   ;;  %v1738_v48 = vld [vmem:[%s3775_s6 + $0x78] sm:$0xff] }
 0x109   :  { %v3003_v36 = vpop.f32.mrf.mxu1  ;;  %2169 = vmatpush3.bf16.msra.mxu0 %v408_v33  ;;  %1614 = vperm.xlu0 %2594, %v1472_v50   ;;  %v3143_v33 = vld [vmem:[%s3771_s2 + $0x34] ss:$8 sps:$4 sm:$0xff]  }
 0x10a   :  { %v708_v37 = vpack.c.bf16 %v3003_v36, %v2993_v30  ;;  %2170 = vmatprep.subr.bf16.mxu0 %v415_v35  ;;  %v2665_v30 = vld [vmem:[%s3771_s2 + $0x90] ss:$8 sps:$4 sm:$0xff]   ;;  %v2666_v36 = vld [vmem:[%s3771_s2 + $0xa4] ss:$8 sps:$4 sm:$0xff]  }
 0x10b   :  { %v3007_v39 = vpop.f32.mrf.mxu1  ;;  %1619 = vperm.xlu1 %2595, %v1473_v18   ;;  %v1736_v18 = vld [vmem:[%s3775_s6 + $0x68] sm:$0xff] }
 0x10c   :  { %v707_v42 = vpack.c.bf16 %v3007_v39, %v3001_v34  ;;  %v2668_v34 = vld [vmem:[%s3771_s2 + $0xa0] ss:$8 sps:$4 sm:$0xff]   ;;  %v2671_v39 = vld [vmem:[%s3771_s2 + $0xb0] ss:$8 sps:$4 sm:$0xff]  }
 0x10d   :  { %v3017_v46 = vpop.f32.mrf.mxu1  ;;  %2171 = vmatpush3.bf16.msra.mxu0 %v407_v38  ;;  %1624 = vperm.xlu0 %2594, %v1474_v52   ;;  %v3782_v52 = vmov 0.0  }
 0x10e   :  { %2172 = vmatprep.subr.bf16.mxu0 %v414_v41  ;;  %v3150_v41 = vld [vmem:[%s3771_s2 + $0x30] ss:$8 sps:$4 sm:$0xff]  }
 0x10f   :  { %v3026_v58 = vpop.f32.mrf.mxu1  ;;  %1629 = vperm.xlu1 %2595, %v1475_v25  }
 0x111   :  { %v3030_v2 = vpop.f32.mrf.mxu1  ;;  %2173 = vmatpush3.bf16.msra.mxu0 %v406_v55  ;;  %1634 = vperm.xlu0 %2594, %v1476_v19   ;;  %v1735_v19 = vld [vmem:[%s3775_s6 + $0x60] sm:$0xff] }
 0x112   :  { %v710_v3 = vpack.c.bf16 %v3030_v2, %v3017_v46  ;;  %2174 = vmatprep.subr.bf16.mxu0 %v413_v1  ;;  %v2663_v2 = vld [vmem:[%s3771_s2 + $0x94] ss:$8 sps:$4 sm:$0xff]  }
 0x113   :  { %v3036_v5 = vpop.f32.mrf.mxu1  ;;  %1709 = vperm.xlu1 %2595, %v1706_v28  }
 0x114   :  { %v709_v62 = vpack.c.bf16 %v3036_v5, %v3026_v58  ;;  %v2662_v58 = vld [vmem:[%s3771_s2 + $0x80] ss:$8 sps:$4 sm:$0xff]   ;;  %v2675_v5 = vld [vmem:[%s3771_s2 + $0xd4] ss:$8 sps:$4 sm:$0xff]  }
 0x115   :  { %v3048_v8 = vpop.f32.mrf.mxu1  ;;  %2175 = vmatpush3.bf16.msra.mxu0 %v405_v4  ;;  %1829 = vperm.xlu0 %2594, %v1826_v26   ;;  %v3162_v4 = vld [vmem:[%s3771_s2 + $0x40] ss:$8 sps:$4 sm:$0xff]  }
 0x116   :  { %2176 = vmatprep.subr.bf16.mxu0 %v412_v57  ;;  %v3314_v26 = vld [vmem:[%s3773_s4] ss:$0 sm:$0xff] }
 0x117   :  { %v3058_v0 = vpop.f32.mrf.mxu1 }
 0x119   :  { %v3062_v10 = vpop.f32.mrf.mxu1  ;;  %2177 = vmatpush3.bf16.msra.mxu0 %v404_v61 }
 0x11a   :  { %2178 = vmatprep.subr.bf16.mxu0 %v411_v9 }
 0x11b   :  { %v3066_v12 = vpop.f32.mrf.mxu1 }
 0x11c   :  { %v711_v44 = vpack.c.bf16 %v3066_v12, %v3058_v0  ;;  %v2659_v12 = vld [vmem:[%s3771_s2 + $0x70] ss:$8 sps:$4 sm:$0xff]  }
 0x11d   :  { %v3076_v51 = vpop.f32.mrf.mxu1  ;;  %2179 = vmatpush3.bf16.msra.mxu0 %v403_v11 }
 0x11e   :  { %2180 = vmatprep.subr.bf16.mxu0 %v410_v63  ;;  %v712_v63 = vpack.c.bf16 %v3062_v10, %v3048_v8  ;;  %v2656_v8 = vld [vmem:[%s3771_s2 + $0x60] ss:$8 sps:$4 sm:$0xff]   ;;  %v2657_v10 = vld [vmem:[%s3771_s2 + $0x74] ss:$8 sps:$4 sm:$0xff]  }
 0x11f   :  { %v3086_v53 = vpop.f32.mrf.mxu1 }
 0x121   :  { %v2522_v14 = vpop.f32.mrf.mxu1  ;;  %2181 = vmatpush3.bf16.msra.mxu0 %v402_v49 }
 0x122   :  { %v714_v6 = vpack.c.bf16 %v2522_v14, %v3076_v51  ;;  %v2680_v14 = vld [vmem:[%s3771_s2 + $0xe0] ss:$8 sps:$4 sm:$0xff]   ;;  %2539 = vmatprep.subr.mxu0 %v3782_v52 }
 0x123   :  { %v631_v16 = vpop.f32.mrf.mxu1 }
 0x124   :  { %955 = vmatmul.mubr.bf16.vlgmr.msra.gmra.mxu0 %v3091_v13  ;;  %v713_v9 = vpack.c.bf16 %v631_v16, %v3086_v53  ;;  %v2660_v53 = vld [vmem:[%s3771_s2 + $0x84] ss:$8 sps:$4 sm:$0xff]   ;;  %v2683_v16 = vld [vmem:[%s3771_s2 + $0xf0] ss:$8 sps:$4 sm:$0xff]  }
 0x125   :  { %v3105_v17 = vpop.f32.mrf.mxu1  ;;  %962 = vmatprep.mubr.bf16.mxu0 %v3096_v15  ;;  %2540 = vmatpush3.msra.mxu0 %v1738_v48 }
 0x126   :  { %2541 = vmatprep.subr.mxu0 %v3782_v52 }
 0x127   :  { %v3114_v20 = vpop.f32.mrf.mxu1 }
 0x129   :  { %v3121_v22 = vpop.f32.mrf.mxu1 }
 0x12a   :  { %v716_v0 = vpack.c.bf16 %v3121_v22, %v3105_v17  ;;  %v1737_v17 = vld [vmem:[%s3775_s6 + $0x70] sm:$0xff]  ;;  %v1732_v22 = vld [vmem:[%s3775_s6 + $0x48] sm:$0xff] }
 0x12b   :  { %v3128_v24 = vpop.f32.mrf.mxu1  ;;  %2542 = vmatpush3.msra.mxu0 %v1737_v17 }
 0x12c   :  { %963 = vmatmul.mubr.bf16.gmra.mxu0 %v3119_v21  ;;  %v715_v46 = vpack.c.bf16 %v3128_v24, %v3114_v20  ;;  %2543 = vmatprep.subr.mxu0 %v3782_v52  ;;  %v1734_v20 = vld [vmem:[%s3775_s6 + $0x58] sm:$0xff] }
 0x12d   :  { %v2529_v27 = vpop.f32.mrf.mxu1  ;;  %970 = vmatprep.mubr.bf16.mxu0 %v3126_v23  ;;  %2544 = vmatpush3.msra.mxu0 %v1736_v18  ;;  %v1730_v24 = vld [vmem:[%s3775_s6 + $0x38] sm:$0xff]  ;;  %v1485_v18 = vpop.permute.xlu1 %1484 }
 0x12e   :  { %2545 = vmatprep.subr.mxu0 %v3782_v52 }
 0x12f   :  { %v660_v29 = vpop.f32.mrf.mxu1  ;;  %2546 = vmatpush3.msra.mxu0 %v1735_v19 }
 0x130   :  { %2547 = vmatprep.subr.mxu0 %v3782_v52 }
 0x131   :  { %v2530_v32 = vpop.f32.mrf.mxu1  ;;  %2548 = vmatpush3.msra.mxu0 %v1734_v20 }
 0x132   :  { %v718_v50 = vpack.c.bf16 %v2530_v32, %v2529_v27  ;;  %2549 = vmatprep.subr.mxu0 %v3782_v52 }
 0x133   :  { %v663_v35 = vpop.f32.mrf.mxu1 }
 0x134   :  { %971 = vmatmul.mubr.bf16.gmra.mxu0 %v3138_v31  ;;  %v717_v49 = vpack.c.bf16 %v663_v35, %v660_v29 }
 0x135   :  { %v2533_v38 = vpop.f32.mrf.mxu1  ;;  %978 = vmatprep.mubr.bf16.mxu0 %v3143_v33 }
 0x137   :  { %v676_v40 = vpop.f32.mrf.mxu1 }
 0x139   :  { %v2534_v43 = vpop.f32.mrf.mxu1 }
 0x13a   :  { %v720_v11 = vpack.c.bf16 %v2534_v43, %v2533_v38  ;;  %v3320_v38 = vpop.permute.xlu0 %1282 }
 0x13b   :  { %v679_v54 = vpop.f32.mrf.mxu1 }
 0x13c   :  { %979 = vmatmul.mubr.bf16.gmra.mxu0 %v3150_v41  ;;  %v719_v51 = vpack.c.bf16 %v679_v54, %v676_v40 }
 0x13d   :  { %v2537_v55 = vpop.f32.mrf.mxu1  ;;  %986 = vmatprep.mubr.bf16.mxu0 %v3155_v47 }
 0x13f   :  { %v692_v1 = vpop.f32.mrf.mxu1 }
 0x141   :  { %v2538_v57 = vpop.f32.mrf.mxu1 }
 0x142   :  { %v722_v56 = vpack.c.bf16 %v2538_v57, %v2537_v55 }
 0x143   :  { %v695_v60 = vpop.f32.mrf.mxu1 }
 0x144   :  { %987 = vmatmul.mubr.bf16.gmra.mxu0 %v3162_v4  ;;  %2278 = vmatprep.subr.bf16.mxu1 %v722_v56  ;;  %v721_v61 = vpack.c.bf16 %v695_v60, %v692_v1  ;;  %v1728_v1 = vld [vmem:[%s3775_s6 + $0x28] sm:$0xff] }
 0x145   :  { %2279 = vmatpush3.bf16.msra.mxu1 %v714_v6  ;;  %994 = vmatprep.mubr.bf16.mxu0 %v3168_v7 }
 0x146   :  { %2280 = vmatprep.subr.bf16.mxu1 %v721_v61 }
 0x149   :  { %2281 = vmatpush3.bf16.msra.mxu1 %v713_v9 }
 0x14a   :  { %2282 = vmatprep.subr.bf16.mxu1 %v720_v11 }
 0x14c   :  { %995 = vmatmul.mubr.bf16.gmra.mxu0 %v3176_v59 }
 0x14d   :  { %2283 = vmatpush3.bf16.msra.mxu1 %v712_v63  ;;  %1002 = vmatprep.mubr.bf16.mxu0 %v3183_v45 }
 0x14e   :  { %2284 = vmatprep.subr.bf16.mxu1 %v719_v51 }
 0x151   :  { %2285 = vmatpush3.bf16.msra.mxu1 %v711_v44  ;;  %v1727_v44 = vld [vmem:[%s3775_s6 + $0x20] sm:$0xff] }
 0x152   :  { %2286 = vmatprep.subr.bf16.mxu1 %v718_v50 }
 0x154   :  { %1003 = vmatmul.mubr.bf16.gmra.mxu0 %v2656_v8 }
 0x155   :  { %2287 = vmatpush3.bf16.msra.mxu1 %v710_v3  ;;  %1010 = vmatprep.mubr.bf16.mxu0 %v2657_v10  ;;  %v2674_v3 = vld [vmem:[%s3771_s2 + $0xc0] ss:$8 sps:$4 sm:$0xff]  }
 0x156   :  { %2288 = vmatprep.subr.bf16.mxu1 %v717_v49 }
 0x159   :  { %2289 = vmatpush3.bf16.msra.mxu1 %v709_v62  ;;  %v2677_v62 = vld [vmem:[%s3771_s2 + $0xd0] ss:$8 sps:$4 sm:$0xff]  }
 0x15a   :  { %2290 = vmatprep.subr.bf16.mxu1 %v716_v0 }
 0x15c   :  { %1011 = vmatmul.mubr.bf16.gmra.mxu0 %v2659_v12 }
 0x15d   :  { %2291 = vmatpush3.bf16.msra.mxu1 %v708_v37  ;;  %1018 = vmatprep.mubr.bf16.mxu0 %v2660_v53  ;;  %v2669_v37 = vld [vmem:[%s3771_s2 + $0xb4] ss:$8 sps:$4 sm:$0xff]  }
 0x15e   :  { %2292 = vmatprep.subr.bf16.mxu1 %v715_v46 }
 0x161   :  { %2293 = vmatpush3.bf16.msra.mxu1 %v707_v42  ;;  %v2672_v42 = vld [vmem:[%s3771_s2 + $0xc4] ss:$8 sps:$4 sm:$0xff]  }
 0x164   :  { %1019 = vmatmul.mubr.bf16.gmra.mxu0 %v2662_v58  ;;  %1116 = vmatmul.mubr.bf16.vlgmr.msra.gmra.mxu1 %v3091_v13  ;;  %v2678_v13 = vld [vmem:[%s3771_s2 + $0xe4] ss:$8 sps:$4 sm:$0xff]  }
 0x165   :  { %1026 = vmatprep.mubr.bf16.mxu0 %v2663_v2  ;;  %1123 = vmatprep.mubr.bf16.mxu1 %v3096_v15  ;;  %v2681_v15 = vld [vmem:[%s3771_s2 + $0xf4] ss:$8 sps:$4 sm:$0xff]  }
 0x16c   :  { %1027 = vmatmul.mubr.bf16.gmra.mxu0 %v2665_v30  ;;  %1124 = vmatmul.mubr.bf16.gmra.mxu1 %v3119_v21  ;;  %v1733_v21 = vld [vmem:[%s3775_s6 + $0x50] sm:$0xff] }
 0x16d   :  { %1034 = vmatprep.mubr.bf16.mxu0 %v2666_v36  ;;  %1131 = vmatprep.mubr.bf16.mxu1 %v3126_v23  ;;  %v1731_v23 = vld [vmem:[%s3775_s6 + $0x40] sm:$0xff] }
 0x16e   :  { %2550 = vmatpush3.msra.mxu0 %v1733_v21  ;;  %v1725_v21 = vld [vmem:[%s3775_s6 + $0x10] sm:$0xff] }
 0x16f   :  { %2551 = vmatprep.subr.mxu0 %v3782_v52 }
 0x170   :  { %2552 = vmatpush3.msra.mxu0 %v1732_v22 }
 0x171   :  { %2553 = vmatprep.subr.mxu0 %v3782_v52 }
 0x172   :  { %2554 = vmatpush3.msra.mxu0 %v1731_v23  ;;  %v1480_v23 = vpop.permute.xlu0 %1479 }
 0x173   :  { %2555 = vmatprep.subr.mxu0 %v3782_v52 }
 0x174   :  { %1035 = vmatmul.mubr.bf16.gmra.mxu0 %v2668_v34  ;;  %1132 = vmatmul.mubr.bf16.gmra.mxu1 %v3138_v31 }
 0x175   :  { %1042 = vmatprep.mubr.bf16.mxu0 %v2669_v37  ;;  %1139 = vmatprep.mubr.bf16.mxu1 %v3143_v33  ;;  %v1729_v33 = vld [vmem:[%s3775_s6 + $0x30] sm:$0xff] }
 0x176   :  { %2556 = vmatpush3.msra.mxu0 %v1730_v24 }
 0x177   :  { %2557 = vmatprep.subr.mxu0 %v3782_v52 }
 0x178   :  { %2558 = vmatpush3.msra.mxu0 %v1729_v33  ;;  %v1490_v33 = vpop.permute.xlu1 %1489 }
 0x179   :  { %2559 = vmatprep.subr.mxu0 %v3782_v52 }
 0x17a   :  { %2560 = vmatpush3.msra.mxu0 %v1728_v1 }
 0x17b   :  { %2561 = vmatprep.subr.mxu0 %v3782_v52 }
 0x17c   :  { %1043 = vmatmul.mubr.bf16.gmra.mxu0 %v2671_v39  ;;  %1140 = vmatmul.mubr.bf16.gmra.mxu1 %v3150_v41 }
 0x17d   :  { %1050 = vmatprep.mubr.bf16.mxu0 %v2672_v42  ;;  %1147 = vmatprep.mubr.bf16.mxu1 %v3155_v47 }
 0x17e   :  { %2562 = vmatpush3.msra.mxu0 %v1727_v44  ;;  %v1723_v44 = vld [vmem:[%s3775_s6] sm:$0xff] }
 0x17f   :  { %2563 = vmatprep.subr.mxu0 %v3782_v52 }
 0x184   :  { %1051 = vmatmul.mubr.bf16.gmra.mxu0 %v2674_v3  ;;  %1148 = vmatmul.mubr.bf16.gmra.mxu1 %v3162_v4 }
 0x185   :  { %1058 = vmatprep.mubr.bf16.mxu0 %v2675_v5  ;;  %1155 = vmatprep.mubr.bf16.mxu1 %v3168_v7 }
 0x18c   :  { %1059 = vmatmul.mubr.bf16.gmra.mxu0 %v2677_v62  ;;  %1156 = vmatmul.mubr.bf16.gmra.mxu1 %v3176_v59 }
 0x18d   :  { %1066 = vmatprep.mubr.bf16.mxu0 %v2678_v13  ;;  %1163 = vmatprep.mubr.bf16.mxu1 %v3183_v45 }
 0x194   :  { %1067 = vmatmul.mubr.bf16.gmra.mxu0 %v2680_v14  ;;  %1164 = vmatmul.mubr.bf16.gmra.mxu1 %v2656_v8 }
 0x195   :  { %1074 = vmatprep.mubr.bf16.mxu0 %v2681_v15  ;;  %1171 = vmatprep.mubr.bf16.mxu1 %v2657_v10 }
 0x19c   :  { %1075 = vmatmul.mubr.bf16.gmra.mxu0 %v2683_v16  ;;  %1172 = vmatmul.mubr.bf16.gmra.mxu1 %v2659_v12 }
 0x19d   :  { %1179 = vmatprep.mubr.bf16.mxu1 %v2660_v53  ;;  %2571 = vmatprep.mubr.msk.f32.mxu0 %vm2721_vm10, %v3782_v52 }
 0x1a4   :  { %1180 = vmatmul.mubr.bf16.gmra.mxu1 %v2662_v58 }
 0x1a5   :  { %1187 = vmatprep.mubr.bf16.mxu1 %v2663_v2 }
 0x1ac   :  { %1188 = vmatmul.mubr.bf16.gmra.mxu1 %v2665_v30 }
 0x1ad   :  { %1195 = vmatprep.mubr.bf16.mxu1 %v2666_v36 }
 0x1b4   :  { %1196 = vmatmul.mubr.bf16.gmra.mxu1 %v2668_v34 }
 0x1b5   :  { %1203 = vmatprep.mubr.bf16.mxu1 %v2669_v37  ;;  %v1726_v37 = vld [vmem:[%s3775_s6 + $0x18] sm:$0xff] }
 0x1b6   :  { %2564 = vmatpush3.msra.mxu0 %v1726_v37 }
 0x1b7   :  { %2565 = vmatprep.subr.mxu0 %v3782_v52 }
 0x1b8   :  { %2566 = vmatpush3.msra.mxu0 %v1725_v21 }
 0x1b9   :  { %2567 = vmatprep.subr.mxu0 %v3782_v52 }
 0x1bc   :  { %1204 = vmatmul.mubr.bf16.gmra.mxu1 %v2671_v39 }
 0x1bd   :  { %1211 = vmatprep.mubr.bf16.mxu1 %v2672_v42 }
 0x1c4   :  { %1212 = vmatmul.mubr.bf16.gmra.mxu1 %v2674_v3 }
 0x1c5   :  { %1219 = vmatprep.mubr.bf16.mxu1 %v2675_v5 }
 0x1cc   :  { %1220 = vmatmul.mubr.bf16.gmra.mxu1 %v2677_v62 }
 0x1cd   :  { %1227 = vmatprep.mubr.bf16.mxu1 %v2678_v13 }
 0x1d4   :  { %1228 = vmatmul.mubr.bf16.gmra.mxu1 %v2680_v14 }
 0x1d5   :  { %1235 = vmatprep.mubr.bf16.mxu1 %v2681_v15 }
 0x1dc   :  { %1236 = vmatmul.mubr.bf16.gmra.mxu1 %v2683_v16 }
 0x1e4   :  { %v2182_v25 = vpop.f32.mrf.mxu0 }
 0x1e6   :  { %v2183_v27 = vpop.f32.mrf.mxu0 }
 0x1e7   :  { %v2184_v28 = vadd.f32 %v2183_v27, %v2182_v25 }
 0x1e8   :  { %v2185_v29 = vpop.f32.mrf.mxu0 }
 0x1e9   :  { %v957_v31 = vadd.f32 %v2184_v28, %v3314_v26 }
 0x1ea   :  { %v2186_v32 = vpop.f32.mrf.mxu0 }
 0x1eb   :  { %v2187_v35 = vadd.f32 %v2186_v32, %v2185_v29  ;;  %v1285_v43 = vmul.f32 %v3320_v38, %v957_v31  ;;  %vm1244_vm0 = vcmp.gt.f32.partialorder %v957_v31, 0.0 }
 0x1ec   :  { %v2188_v40 = vpop.f32.mrf.mxu0 }
 0x1ed   :  { %v960_v41 = vadd.f32 %v2187_v35, %v3314_v26  ;;  %v3329_v6 = vsel %vm1244_vm0, %v957_v31, %v1285_v43  ;;  %v1495_v43 = vpop.permute.xlu0 %1494 }
 0x1ee   :  { %v2189_v47 = vpop.f32.mrf.mxu0 }
 0x1ef   :  { %vm1245_vm1 = vcmp.gt.f32.partialorder %v960_v41, 0.0  ;;  %v1286_v54 = vmul.f32 %v3320_v38, %v960_v41  ;;  %v2190_v55 = vadd.f32 %v2189_v47, %v2188_v40 }
 0x1f0   :  { %v2191_v4 = vpop.f32.mrf.mxu0 }
 0x1f1   :  { %v3331_v57 = vsel %vm1245_vm1, %v960_v41, %v1286_v54  ;;  %v965_v7 = vadd.f32 %v2190_v55, %v3314_v26  ;;  %v1724_v54 = vld [vmem:[%s3775_s6 + $0x8] sm:$0xff] }
 0x1f2   :  { %v2192_v60 = vpop.f32.mrf.mxu0  ;;  %2568 = vmatpush3.msra.mxu0 %v1724_v54 }
 0x1f3   :  { %v2193_v61 = vadd.f32 %v2192_v60, %v2191_v4  ;;  %v1287_v11 = vmul.f32 %v3320_v38, %v965_v7  ;;  %vm1246_vm2 = vcmp.gt.f32.partialorder %v965_v7, 0.0  ;;  %2569 = vmatprep.subr.mxu0 %v3782_v52 }
 0x1f4   :  { %v2194_v9 = vpop.f32.mrf.mxu0  ;;  %2570 = vmatpush3.msra.mxu0 %v1723_v44 }
 0x1f5   :  { %v968_v59 = vadd.f32 %v2193_v61, %v3314_v26  ;;  %v3343_v8 = vsel %vm1246_vm2, %v965_v7, %v1287_v11  ;;  %v1500_v61 = vpop.permute.xlu1 %1499  ;;  %v1638_v11 = vmul.f32 %v1485_v18, %v3331_v57 }
 0x1f6   :  { %v2195_v63 = vpop.f32.mrf.mxu0 }
 0x1f7   :  { %vm1247_vm3 = vcmp.gt.f32.partialorder %v968_v59, 0.0  ;;  %v1288_v45 = vmul.f32 %v3320_v38, %v968_v59  ;;  %v2196_v51 = vadd.f32 %v2195_v63, %v2194_v9 }
 0x1f8   :  { %v2197_v50 = vpop.f32.mrf.mxu0 }
 0x1f9   :  { %v3345_v10 = vsel %vm1247_vm3, %v968_v59, %v1288_v45  ;;  %v973_v49 = vadd.f32 %v2196_v51, %v3314_v26  ;;  %v1505_v59 = vpop.permute.xlu0 %1504  ;;  %v1637_v45 = vmul.f32 %v1480_v23, %v3329_v6  ;;  %v1639_v51 = vmul.f32 %v1490_v33, %v3343_v8 }
 0x1fa   :  { %v2198_v0 = vpop.f32.mrf.mxu0 }
 0x1fb   :  { %v2199_v53 = vadd.f32 %v2198_v0, %v2197_v50  ;;  %v1289_v58 = vmul.f32 %v3320_v38, %v973_v49  ;;  %vm1248_vm4 = vcmp.gt.f32.partialorder %v973_v49, 0.0  ;;  %v1669_v0 = vadd.f32 %v1638_v11, %v1637_v45 }
 0x1fc   :  { %v2200_v46 = vpop.f32.mrf.mxu0 }
 0x1fd   :  { %v976_v2 = vadd.f32 %v2199_v53, %v3314_v26  ;;  %v3357_v42 = vsel %vm1248_vm4, %v973_v49, %v1289_v58  ;;  %v1640_v53 = vmul.f32 %v1495_v43, %v3345_v10 }
 0x1fe   :  { %v2201_v30 = vpop.f32.mrf.mxu0 }
 0x1ff   :  { %vm1249_vm5 = vcmp.gt.f32.partialorder %v976_v2, 0.0  ;;  %v1290_v36 = vmul.f32 %v3320_v38, %v976_v2  ;;  %v2202_v34 = vadd.f32 %v2201_v30, %v2200_v46  ;;  %v1510_v46 = vpop.permute.xlu1 %1509  ;;  %v1670_v30 = vadd.f32 %v1669_v0, %v1639_v51 }
 0x200   :  { %v2203_v39 = vpop.f32.mrf.mxu0 }
 0x201   :  { %v3359_v3 = vsel %vm1249_vm5, %v976_v2, %v1290_v36  ;;  %v981_v5 = vadd.f32 %v2202_v34, %v3314_v26  ;;  %v1641_v36 = vmul.f32 %v1500_v61, %v3357_v42  ;;  %v1515_v34 = vpop.permute.xlu0 %1514 }
 0x202   :  { %v2204_v62 = vpop.f32.mrf.mxu0 }
 0x203   :  { %v2205_v14 = vadd.f32 %v2204_v62, %v2203_v39  ;;  %v1291_v16 = vmul.f32 %v3320_v38, %v981_v5  ;;  %vm1250_vm6 = vcmp.gt.f32.partialorder %v981_v5, 0.0  ;;  %v1642_v62 = vmul.f32 %v1505_v59, %v3359_v3 }
 0x204   :  { %v2206_v15 = vpop.f32.mrf.mxu0 }
 0x205   :  { %v984_v48 = vadd.f32 %v2205_v14, %v3314_v26  ;;  %v3371_v24 = vsel %vm1250_vm6, %v981_v5, %v1291_v16  ;;  %v1671_v5 = vadd.f32 %v1670_v30, %v1640_v53  ;;  %v1525_v21 = vpop.permute.xlu0 %1524 }
 0x206   :  { %v2207_v17 = vpop.f32.mrf.mxu0 }
 0x207   :  { %vm1251_vm7 = vcmp.gt.f32.partialorder %v984_v48, 0.0  ;;  %v1292_v19 = vmul.f32 %v3320_v38, %v984_v48  ;;  %v2208_v20 = vadd.f32 %v2207_v17, %v2206_v15  ;;  %v1672_v16 = vadd.f32 %v1671_v5, %v1641_v36 }
 0x208   :  { %v2209_v22 = vpop.f32.mrf.mxu0  ;;  %v1643_v17 = vmul.f32 %v1510_v46, %v3371_v24 }
 0x209   :  { %v3373_v25 = vsel %vm1251_vm7, %v984_v48, %v1292_v19  ;;  %v989_v27 = vadd.f32 %v2208_v20, %v3314_v26  ;;  %v1520_v48 = vpop.permute.xlu1 %1519  ;;  %v1673_v20 = vadd.f32 %v1672_v16, %v1642_v62  ;;  %v1535_v11 = vpop.permute.xlu0 %1534 }
 0x20a   :  { %v2210_v28 = vpop.f32.mrf.mxu0 }
 0x20b   :  { %v2211_v31 = vadd.f32 %v2210_v28, %v2209_v22  ;;  %v1293_v35 = vmul.f32 %v3320_v38, %v989_v27  ;;  %vm1252_vm8 = vcmp.gt.f32.partialorder %v989_v27, 0.0  ;;  %v1644_v22 = vmul.f32 %v1515_v34, %v3373_v25 }
 0x20c   :  { %v2212_v32 = vpop.f32.mrf.mxu0 }
 0x20d   :  { %v992_v40 = vadd.f32 %v2211_v31, %v3314_v26  ;;  %v3385_v1 = vsel %vm1252_vm8, %v989_v27, %v1293_v35  ;;  %v1674_v31 = vadd.f32 %v1673_v20, %v1643_v17 }
 0x20e   :  { %v2213_v41 = vpop.f32.mrf.mxu0 }
 0x20f   :  { %vm1253_vm9 = vcmp.gt.f32.partialorder %v992_v40, 0.0  ;;  %v1294_v47 = vmul.f32 %v3320_v38, %v992_v40  ;;  %v2214_v50 = vadd.f32 %v2213_v41, %v2212_v32  ;;  %v1645_v32 = vmul.f32 %v1520_v48, %v3385_v1  ;;  %v1530_v41 = vpop.permute.xlu1 %1529 }
 0x210   :  { %v2215_v55 = vpop.f32.mrf.mxu0  ;;  %v1675_v43 = vadd.f32 %v1674_v31, %v1644_v22 }
 0x211   :  { %v3387_v4 = vsel %vm1253_vm9, %v992_v40, %v1294_v47  ;;  %v997_v37 = vadd.f32 %v2214_v50, %v3314_v26 }
 0x212   :  { %v2216_v7 = vpop.f32.mrf.mxu0  ;;  %v1646_v47 = vmul.f32 %v1525_v21, %v3387_v4  ;;  %v1676_v59 = vadd.f32 %v1675_v43, %v1645_v32 }
 0x213   :  { %v2217_v58 = vadd.f32 %v2216_v7, %v2215_v55  ;;  %v1295_v18 = vmul.f32 %v3320_v38, %v997_v37  ;;  %vm1254_vm11 = vcmp.gt.f32.partialorder %v997_v37, 0.0 }
 0x214   :  { %v2218_v9 = vpop.f32.mrf.mxu0  ;;  %v1677_v0 = vadd.f32 %v1676_v59, %v1646_v47  ;;  %v1545_v59 = vpop.permute.xlu0 %1544 }
 0x215   :  { %v1000_v14 = vadd.f32 %v2217_v58, %v3314_v26  ;;  %v3409_v33 = vsel %vm1254_vm11, %v997_v37, %v1295_v18 }
 0x216   :  { %v2219_v63 = vpop.f32.mrf.mxu0 }
 0x217   :  { %v2220_v23 = vadd.f32 %v2219_v63, %v2218_v9  ;;  %v1296_v27 = vmul.f32 %v3320_v38, %v1000_v14  ;;  %vm1255_vm12 = vcmp.gt.f32.partialorder %v1000_v14, 0.0  ;;  %v1647_v63 = vmul.f32 %v1530_v41, %v3409_v33 }
 0x218   :  { %v2221_v49 = vpop.f32.mrf.mxu0 }
 0x219   :  { %v1005_v54 = vadd.f32 %v2220_v23, %v3314_v26  ;;  %v3413_v55 = vsel %vm1255_vm12, %v1000_v14, %v1296_v27  ;;  %v1678_v36 = vadd.f32 %v1677_v0, %v1647_v63  ;;  %v1540_v27 = vpop.permute.xlu1 %1539 }
 0x21a   :  { %v2222_v2 = vpop.f32.mrf.mxu0  ;;  %v1648_v53 = vmul.f32 %v1535_v11, %v3413_v55 }
 0x21b   :  { %v2223_v7 = vadd.f32 %v2222_v2, %v2221_v49  ;;  %v1297_v46 = vmul.f32 %v3320_v38, %v1005_v54  ;;  %vm1256_vm13 = vcmp.gt.f32.partialorder %v1005_v54, 0.0 }
 0x21c   :  { %v2224_v39 = vpop.f32.mrf.mxu0  ;;  %v3421_v48 = vadd.f32 %v1678_v36, %v1648_v53 }
 0x21d   :  { %v1008_v30 = vadd.f32 %v2223_v7, %v3314_v26  ;;  %v3423_v17 = vsel %vm1256_vm13, %v1005_v54, %v1297_v46 }
 0x21e   :  { %v2225_v15 = vpop.f32.mrf.mxu0  ;;  %v1649_v63 = vmul.f32 %v1540_v27, %v3423_v17 }
 0x21f   :  { %v2226_v58 = vadd.f32 %v2225_v15, %v2224_v39  ;;  %v1298_v15 = vmul.f32 %v3320_v38, %v1008_v30  ;;  %vm1257_vm14 = vcmp.gt.f32.partialorder %v1008_v30, 0.0 }
 0x220   :  { %v2227_v19 = vpop.f32.mrf.mxu0 }
 0x221   :  { %v1013_v39 = vadd.f32 %v2226_v58, %v3314_v26  ;;  %v3434_v54 = vsel %vm1257_vm14, %v1008_v30, %v1298_v15 }
 0x222   :  { %v2228_v28 = vpop.f32.mrf.mxu0 }
 0x223   :  { %v2229_v18 = vadd.f32 %v2228_v28, %v2227_v19  ;;  %v1299_v28 = vmul.f32 %v3320_v38, %v1013_v39  ;;  %vm1258_vm3 = vcmp.gt.f32.partialorder %v1013_v39, 0.0 }
 0x224   :  { %v2230_v35 = vpop.f32.mrf.mxu0  ;;  %v2294_v40 = vpop.f32.mrf.mxu1 }
 0x225   :  { %v1016_v7 = vadd.f32 %v2229_v18, %v3314_v26  ;;  %v3450_v36 = vsel %vm1258_vm3, %v1013_v39, %v1299_v28 }
 0x226   :  { %v2231_v61 = vpop.f32.mrf.mxu0  ;;  %v2295_v9 = vpop.f32.mrf.mxu1 }
 0x227   :  { %v2232_v45 = vadd.f32 %v2231_v61, %v2230_v35  ;;  %v2296_v51 = vadd.f32 %v2295_v9, %v2294_v40  ;;  %vm1259_vm4 = vcmp.gt.f32.partialorder %v1016_v7, 0.0 }
 0x228   :  { %v2233_v44 = vpop.f32.mrf.mxu0  ;;  %v2297_v50 = vpop.f32.mrf.mxu1 }
 0x229   :  { %v1021_v34 = vadd.f32 %v2232_v45, %v3314_v26  ;;  %v1118_v37 = vadd.f32 %v2296_v51, %v3314_v26 }
 0x22a   :  { %v2234_v49 = vpop.f32.mrf.mxu0  ;;  %v2298_v2 = vpop.f32.mrf.mxu1 }
 0x22b   :  { %v2235_v5 = vadd.f32 %v2234_v49, %v2233_v44  ;;  %v2299_v62 = vadd.f32 %v2298_v2, %v2297_v50  ;;  %v1301_v31 = vmul.f32 %v3320_v38, %v1021_v34  ;;  %v1381_v40 = vmul.f32 %v3320_v38, %v1118_v37  ;;  %v1550_v49 = vpop.permute.xlu1 %1549 }
 0x22c   :  { %v2236_v14 = vpop.f32.mrf.mxu0  ;;  %v2300_v16 = vpop.f32.mrf.mxu1  ;;  %vm1260_vm1 = vcmp.gt.f32.partialorder %v1021_v34, 0.0  ;;  %vm1349_vm2 = vcmp.gt.f32.partialorder %v1118_v37, 0.0  ;;  %v1650_v2 = vmul.f32 %v1545_v59, %v3434_v54 }
 0x22d   :  { %v1024_v20 = vadd.f32 %v2235_v5, %v3314_v26  ;;  %v1121_v21 = vadd.f32 %v2299_v62, %v3314_v26  ;;  %v3444_v50 = vsel %vm1260_vm1, %v1021_v34, %v1301_v31  ;;  %v3446_v0 = vsel %vm1349_vm2, %v1118_v37, %v1381_v40  ;;  %v1555_v31 = vpop.permute.xlu0 %1554 }
 0x22e   :  { %v2237_v22 = vpop.f32.mrf.mxu0  ;;  %v2301_v23 = vpop.f32.mrf.mxu1  ;;  %3792 = vst [vmem:[#allocation9_spill] sm:$0xff] %v3446_v0  ;;  %v1300_v34 = vmul.f32 %v3320_v38, %v1016_v7 }
 0x22f   :  { %v2238_v32 = vadd.f32 %v2237_v22, %v2236_v14  ;;  %v2302_v35 = vadd.f32 %v2301_v23, %v2300_v16  ;;  %vm1261_vm15 = vcmp.gt.f32.partialorder %v1024_v20, 0.0  ;;  %v1302_v41 = vmul.f32 %v3320_v38, %v1024_v20 }
 0x230   :  { %vm1350_vm0 = vcmp.gt.f32.partialorder %v1121_v21, 0.0  ;;  %v2239_v43 = vpop.f32.mrf.mxu0  ;;  %v2303_v19 = vpop.f32.mrf.mxu1  ;;  %v1382_v47 = vmul.f32 %v3320_v38, %v1121_v21  ;;  %v3466_v40 = vsel %vm1259_vm4, %v1016_v7, %v1300_v34 }
 0x231   :  { %v3437_v61 = vsel %vm1261_vm15, %v1024_v20, %v1302_v41  ;;  %v1029_v51 = vadd.f32 %v2238_v32, %v3314_v26  ;;  %v1126_v44 = vadd.f32 %v2302_v35, %v3314_v26  ;;  %v1680_v32 = vadd.f32 %v3421_v48, %v1649_v63 }
 0x232   :  { %v2240_v9 = vpop.f32.mrf.mxu0  ;;  %v2304_v11 = vpop.f32.mrf.mxu1  ;;  %v3440_v45 = vsel %vm1350_vm0, %v1121_v21, %v1382_v47  ;;  %v1651_v35 = vmul.f32 %v1550_v49, %v3450_v36  ;;  %v1652_v49 = vmul.f32 %v1555_v31, %v3466_v40 }
 0x233   :  { %3791 = vst [vmem:[#allocation8_spill] sm:$0xff] %v3440_v45  ;;  %v2241_v53 = vadd.f32 %v2240_v9, %v2239_v43  ;;  %v2305_v46 = vadd.f32 %v2304_v11, %v2303_v19  ;;  %vm1262_vm5 = vcmp.gt.f32.partialorder %v1029_v51, 0.0  ;;  %v1303_v18 = vmul.f32 %v3320_v38, %v1029_v51  ;;  %v1560_v47 = vpop.permute.xlu1 %1559 }
 0x234   :  { %v2242_v58 = vpop.f32.mrf.mxu0  ;;  %v2306_v30 = vpop.f32.mrf.mxu1  ;;  %v1383_v39 = vmul.f32 %v3320_v38, %v1126_v44  ;;  %vm1351_vm8 = vcmp.gt.f32.partialorder %v1126_v44, 0.0  ;;  %v1681_v9 = vadd.f32 %v1680_v32, %v1650_v2 }
 0x235   :  { %v1032_v37 = vadd.f32 %v2241_v53, %v3314_v26  ;;  %v1129_v14 = vadd.f32 %v2305_v46, %v3314_v26  ;;  %v3473_v59 = vsel %vm1262_vm5, %v1029_v51, %v1303_v18 }
 0x236   :  { %v2243_v16 = vpop.f32.mrf.mxu0  ;;  %v2307_v15 = vpop.f32.mrf.mxu1  ;;  %v3475_v53 = vsel %vm1351_vm8, %v1126_v44, %v1383_v39  ;;  %v1682_v2 = vadd.f32 %v1681_v9, %v1651_v35 }
 0x237   :  { %v2308_v20 = vadd.f32 %v2307_v15, %v2306_v30  ;;  %vm1263_vm6 = vcmp.gt.f32.partialorder %v1032_v37, 0.0  ;;  %v1304_v21 = vmul.f32 %v3320_v38, %v1032_v37  ;;  %vm1352_vm7 = vcmp.gt.f32.partialorder %v1129_v14, 0.0  ;;  %3794 = vst [vmem:[#allocation11_spill] sm:$0xff] %v3475_v53  ;;  %v1565_v44 = vpop.permute.xlu0 %1564 }
 0x238   :  { %v1384_v22 = vmul.f32 %v3320_v38, %v1129_v14  ;;  %v2245_v23 = vpop.f32.mrf.mxu0  ;;  %v2309_v27 = vpop.f32.mrf.mxu1  ;;  %v2244_v11 = vadd.f32 %v2243_v16, %v2242_v58  ;;  %v1683_v31 = vadd.f32 %v1682_v2, %v1652_v49  ;;  %v1654_v35 = vmul.f32 %v1565_v44, %v3437_v61 }
 0x239   :  { %v3470_v28 = vsel %vm1263_vm6, %v1032_v37, %v1304_v21  ;;  %v1134_v48 = vadd.f32 %v2308_v20, %v3314_v26 }
 0x23a   :  { %v3468_v41 = vsel %vm1352_vm7, %v1129_v14, %v1384_v22  ;;  %v2246_v43 = vpop.f32.mrf.mxu0  ;;  %v2310_v19 = vpop.f32.mrf.mxu1  ;;  %v1653_v14 = vmul.f32 %v1560_v47, %v3444_v50  ;;  %v1037_v16 = vadd.f32 %v2244_v11, %v3314_v26 }
 0x23b   :  { %3793 = vst [vmem:[#allocation10_spill] sm:$0xff] %v3468_v41  ;;  %v2311_v63 = vadd.f32 %v2310_v19, %v2309_v27  ;;  %v2247_v15 = vadd.f32 %v2246_v43, %v2245_v23  ;;  %v1385_v39 = vmul.f32 %v3320_v38, %v1134_v48  ;;  %v1570_v27 = vpop.permute.xlu1 %1569  ;;  %vm1353_vm10 = vcmp.gt.f32.partialorder %v1134_v48, 0.0 }
 0x23c   :  { %v2248_v46 = vpop.f32.mrf.mxu0  ;;  %v2312_v7 = vpop.f32.mrf.mxu1  ;;  %v1684_v11 = vadd.f32 %v1683_v31, %v1653_v14  ;;  %v1305_v23 = vmul.f32 %v3320_v38, %v1037_v16  ;;  %vm1264_vm11 = vcmp.gt.f32.partialorder %v1037_v16, 0.0 }
 0x23d   :  { %v1137_v58 = vadd.f32 %v2311_v63, %v3314_v26  ;;  %v1040_v43 = vadd.f32 %v2247_v15, %v3314_v26  ;;  %v3493_v63 = vsel %vm1353_vm10, %v1134_v48, %v1385_v39  ;;  %v1655_v15 = vmul.f32 %v1570_v27, %v3473_v59 }
 0x23e   :  { %v2249_v51 = vpop.f32.mrf.mxu0  ;;  %v2313_v37 = vpop.f32.mrf.mxu1  ;;  %3796 = vst [vmem:[#allocation13_spill] sm:$0xff] %v3493_v63  ;;  %v1685_v48 = vadd.f32 %v1684_v11, %v1654_v35  ;;  %v3503_v52 = vsel %vm1264_vm11, %v1037_v16, %v1305_v23 }
 0x23f   :  { %v2314_v18 = vadd.f32 %v2313_v37, %v2312_v7  ;;  %vm1354_vm9 = vcmp.gt.f32.partialorder %v1137_v58, 0.0  ;;  %v1386_v20 = vmul.f32 %v3320_v38, %v1137_v58  ;;  %v2250_v32 = vadd.f32 %v2249_v51, %v2248_v46  ;;  %v1575_v46 = vpop.permute.xlu0 %1574  ;;  %v1580_v39 = vpop.permute.xlu1 %1579 }
 0x240   :  { %v2251_v21 = vpop.f32.mrf.mxu0  ;;  %v2315_v22 = vpop.f32.mrf.mxu1  ;;  %vm1265_vm12 = vcmp.gt.f32.partialorder %v1040_v43, 0.0  ;;  %v1656_v35 = vmul.f32 %v1575_v46, %v3470_v28  ;;  %v1686_v34 = vadd.f32 %v1685_v48, %v1655_v15 }
 0x241   :  { %v3489_v19 = vsel %vm1354_vm9, %v1137_v58, %v1386_v20  ;;  %v1142_v7 = vadd.f32 %v2314_v18, %v3314_v26  ;;  %v1045_v51 = vadd.f32 %v2250_v32, %v3314_v26  ;;  %v1306_v18 = vmul.f32 %v3320_v38, %v1040_v43 }
 0x242   :  { %3795 = vst [vmem:[#allocation12_spill] sm:$0xff] %v3489_v19  ;;  %v2252_v47 = vpop.f32.mrf.mxu0  ;;  %v2316_v9 = vpop.f32.mrf.mxu1  ;;  %v1687_v30 = vadd.f32 %v1686_v34, %v1656_v35 }
 0x243   :  { %v2317_v37 = vadd.f32 %v2316_v9, %v2315_v22  ;;  %v2253_v58 = vadd.f32 %v2252_v47, %v2251_v21  ;;  %v1387_v21 = vmul.f32 %v3320_v38, %v1142_v7  ;;  %v1307_v62 = vmul.f32 %v3320_v38, %v1045_v51 }
 0x244   :  { %v2254_v49 = vpop.f32.mrf.mxu0  ;;  %v2318_v2 = vpop.f32.mrf.mxu1  ;;  %vm1355_vm14 = vcmp.gt.f32.partialorder %v1142_v7, 0.0  ;;  %vm1266_vm15 = vcmp.gt.f32.partialorder %v1045_v51, 0.0 }
 0x245   :  { %v1145_v14 = vadd.f32 %v2317_v37, %v3314_v26  ;;  %v1048_v27 = vadd.f32 %v2253_v58, %v3314_v26  ;;  %v3517_v44 = vsel %vm1355_vm14, %v1142_v7, %v1387_v21  ;;  %v3522_v12 = vsel %vm1266_vm15, %v1045_v51, %v1307_v62 }
 0x246   :  { %v2255_v20 = vpop.f32.mrf.mxu0  ;;  %v2319_v31 = vpop.f32.mrf.mxu1  ;;  %3798 = vst [vmem:[#allocation15_spill] sm:$0xff] %v3517_v44 }
 0x247   :  { %v2256_v22 = vadd.f32 %v2255_v20, %v2254_v49  ;;  %v2320_v9 = vadd.f32 %v2319_v31, %v2318_v2  ;;  %vm1356_vm13 = vcmp.gt.f32.partialorder %v1145_v14, 0.0  ;;  %v1388_v32 = vmul.f32 %v3320_v38, %v1145_v14  ;;  %v1585_v2 = vpop.permute.xlu0 %1584 }
 0x248   :  { %v2257_v47 = vpop.f32.mrf.mxu0  ;;  %v2321_v37 = vpop.f32.mrf.mxu1  ;;  %v3514_v20 = vsel %vm1265_vm12, %v1040_v43, %v1306_v18  ;;  %v1657_v31 = vmul.f32 %v1580_v39, %v3503_v52  ;;  %vm1267_vm0 = vcmp.gt.f32.partialorder %v1048_v27, 0.0 }
 0x249   :  { %v3510_v11 = vsel %vm1356_vm13, %v1145_v14, %v1388_v32  ;;  %v1053_v16 = vadd.f32 %v2256_v22, %v3314_v26  ;;  %v1150_v58 = vadd.f32 %v2320_v9, %v3314_v26  ;;  %v1590_v32 = vpop.permute.xlu1 %1589  ;;  %v1308_v22 = vmul.f32 %v3320_v38, %v1048_v27 }
 0x24a   :  { %3797 = vst [vmem:[#allocation14_spill] sm:$0xff] %v3510_v11  ;;  %v2258_v23 = vpop.f32.mrf.mxu0  ;;  %v2322_v49 = vpop.f32.mrf.mxu1 }
 0x24b   :  { %v2259_v56 = vadd.f32 %v2258_v23, %v2257_v47  ;;  %v2323_v46 = vadd.f32 %v2322_v49, %v2321_v37  ;;  %v1309_v7 = vmul.f32 %v3320_v38, %v1053_v16  ;;  %vm1268_vm1 = vcmp.gt.f32.partialorder %v1053_v16, 0.0  ;;  %v1595_v35 = vpop.permute.xlu0 %1594 }
 0x24c   :  { %v2260_v5 = vpop.f32.mrf.mxu0  ;;  %v2324_v14 = vpop.f32.mrf.mxu1  ;;  %v1658_v47 = vmul.f32 %v1585_v2, %v3514_v20  ;;  %v1389_v62 = vmul.f32 %v3320_v38, %v1150_v58  ;;  %vm1357_vm3 = vcmp.gt.f32.partialorder %v1150_v58, 0.0  ;;  %v1659_v23 = vmul.f32 %v1590_v32, %v3522_v12 }
 0x24d   :  { %v1056_v15 = vadd.f32 %v2259_v56, %v3314_v26  ;;  %v1153_v48 = vadd.f32 %v2323_v46, %v3314_v26  ;;  %v3533_v56 = vsel %vm1267_vm0, %v1048_v27, %v1308_v22  ;;  %v1688_v49 = vadd.f32 %v1687_v30, %v1657_v31  ;;  %v1600_v43 = vpop.permute.xlu1 %1599 }
 0x24e   :  { %v2261_v39 = vpop.f32.mrf.mxu0  ;;  %v2325_v18 = vpop.f32.mrf.mxu1  ;;  %v3544_v22 = vsel %vm1357_vm3, %v1150_v58, %v1389_v62 }
 0x24f   :  { %v2262_v9 = vadd.f32 %v2261_v39, %v2260_v5  ;;  %v2326_v21 = vadd.f32 %v2325_v18, %v2324_v14  ;;  %vm1358_vm2 = vcmp.gt.f32.partialorder %v1153_v48, 0.0  ;;  %v1390_v34 = vmul.f32 %v3320_v38, %v1153_v48 }
 0x250   :  { %v2263_v51 = vpop.f32.mrf.mxu0  ;;  %v2327_v37 = vpop.f32.mrf.mxu1  ;;  %v1310_v5 = vmul.f32 %v3320_v38, %v1056_v15  ;;  %v3541_v18 = vsel %vm1268_vm1, %v1053_v16, %v1309_v7  ;;  %vm1269_vm4 = vcmp.gt.f32.partialorder %v1056_v15, 0.0  ;;  %v1689_v27 = vadd.f32 %v1688_v49, %v1658_v47 }
 0x251   :  { %v3537_v46 = vsel %vm1358_vm2, %v1153_v48, %v1390_v34  ;;  %v1061_v2 = vadd.f32 %v2262_v9, %v3314_v26  ;;  %v1158_v13 = vadd.f32 %v2326_v21, %v3314_v26  ;;  %v1661_v48 = vmul.f32 %v1600_v43, %v3541_v18 }
 0x252   :  { %v2264_v14 = vpop.f32.mrf.mxu0  ;;  %v2328_v39 = vpop.f32.mrf.mxu1  ;;  %v1660_v9 = vmul.f32 %v1595_v35, %v3533_v56  ;;  %v1690_v34 = vadd.f32 %v1689_v27, %v1659_v23  ;;  %v3554_v62 = vsel %vm1269_vm4, %v1056_v15, %v1310_v5 }
 0x253   :  { %v2265_v32 = vadd.f32 %v2264_v14, %v2263_v51  ;;  %v2329_v30 = vadd.f32 %v2328_v39, %v2327_v37  ;;  %v1311_v7 = vmul.f32 %v3320_v38, %v1061_v2  ;;  %v1605_v51 = vpop.permute.xlu0 %1604  ;;  %vm1270_vm5 = vcmp.gt.f32.partialorder %v1061_v2, 0.0  ;;  %v1610_v27 = vpop.permute.xlu1 %1609 }
 0x254   :  { %v2266_v31 = vpop.f32.mrf.mxu0  ;;  %v2330_v29 = vpop.f32.mrf.mxu1  ;;  %v1391_v43 = vmul.f32 %v3320_v38, %v1158_v13  ;;  %vm1359_vm6 = vcmp.gt.f32.partialorder %v1158_v13, 0.0  ;;  %v1691_v15 = vadd.f32 %v1690_v34, %v1660_v9 }
 0x255   :  { %v1064_v60 = vadd.f32 %v2265_v32, %v3314_v26  ;;  %v1161_v21 = vadd.f32 %v2329_v30, %v3314_v26 }
 0x256   :  { %v2267_v58 = vpop.f32.mrf.mxu0  ;;  %v2331_v47 = vpop.f32.mrf.mxu1  ;;  %v1692_v45 = vadd.f32 %v1691_v15, %v1661_v48 }
 0x257   :  { %v2268_v37 = vadd.f32 %v2267_v58, %v2266_v31  ;;  %v2332_v35 = vadd.f32 %v2331_v47, %v2330_v29  ;;  %v1312_v23 = vmul.f32 %v3320_v38, %v1064_v60  ;;  %vm1360_vm7 = vcmp.gt.f32.partialorder %v1161_v21, 0.0 }
 0x258   :  { %v1392_v49 = vmul.f32 %v3320_v38, %v1161_v21  ;;  %v2269_v14 = vpop.f32.mrf.mxu0  ;;  %v2333_v39 = vpop.f32.mrf.mxu1  ;;  %vm1271_vm8 = vcmp.gt.f32.partialorder %v1064_v60, 0.0  ;;  %v3564_v29 = vsel %vm1270_vm5, %v1061_v2, %v1311_v7  ;;  %v1662_v58 = vmul.f32 %v1605_v51, %v3554_v62 }
 0x259   :  { %v1069_v32 = vadd.f32 %v2268_v37, %v3314_v26  ;;  %v1166_v30 = vadd.f32 %v2332_v35, %v3314_v26  ;;  %v3568_v47 = vsel %vm1359_vm6, %v1158_v13, %v1391_v43  ;;  %v3572_v35 = vsel %vm1271_vm8, %v1064_v60, %v1312_v23 }
 0x25a   :  { %v3560_v5 = vsel %vm1360_vm7, %v1161_v21, %v1392_v49  ;;  %v2270_v16 = vpop.f32.mrf.mxu0  ;;  %v2334_v31 = vpop.f32.mrf.mxu1  ;;  %v1663_v2 = vmul.f32 %v1610_v27, %v3564_v29 }
 0x25b   :  { %v1313_v0 = vmul.f32 %v3320_v38, %v1069_v32  ;;  %vm1272_vm9 = vcmp.gt.f32.partialorder %v1069_v32, 0.0  ;;  %v2271_v37 = vadd.f32 %v2270_v16, %v2269_v14  ;;  %v2335_v9 = vadd.f32 %v2334_v31, %v2333_v39  ;;  %v1615_v49 = vpop.permute.xlu0 %1614  ;;  %v1620_v39 = vpop.permute.xlu1 %1619 }
 0x25c   :  { %v2272_v34 = vpop.f32.mrf.mxu0  ;;  %v2336_v21 = vpop.f32.mrf.mxu1  ;;  %v1393_v13 = vmul.f32 %v3320_v38, %v1166_v30  ;;  %v1693_v14 = vadd.f32 %v1692_v45, %v1662_v58  ;;  %v1664_v23 = vmul.f32 %v1615_v49, %v3572_v35  ;;  %vm1361_vm12 = vcmp.gt.f32.partialorder %v1166_v30, 0.0 }
 0x25d   :  { %v1072_v51 = vadd.f32 %v2271_v37, %v3314_v26  ;;  %v1169_v48 = vadd.f32 %v2335_v9, %v3314_v26  ;;  %v3581_v60 = vsel %vm1272_vm9, %v1069_v32, %v1313_v0 }
 0x25e   :  { %v2273_v43 = vpop.f32.mrf.mxu0  ;;  %v2337_v16 = vpop.f32.mrf.mxu1  ;;  %v1665_v0 = vmul.f32 %v1620_v39, %v3581_v60  ;;  %v1694_v32 = vadd.f32 %v1693_v14, %v1663_v2  ;;  %v3592_v41 = vsel %vm1361_vm12, %v1166_v30, %v1393_v13 }
 0x25f   :  { %v2274_v15 = vadd.f32 %v2273_v43, %v2272_v34  ;;  %v2338_v31 = vadd.f32 %v2337_v16, %v2336_v21  ;;  %vm1273_vm10 = vcmp.gt.f32.partialorder %v1072_v51, 0.0  ;;  %v1314_v27 = vmul.f32 %v3320_v38, %v1072_v51  ;;  %v1625_v16 = vpop.permute.xlu0 %1624 }
 0x260   :  { %vm1362_vm11 = vcmp.gt.f32.partialorder %v1169_v48, 0.0  ;;  %v1394_v7 = vmul.f32 %v3320_v38, %v1169_v48  ;;  %v2275_v37 = vpop.f32.mrf.mxu0  ;;  %v2339_v53 = vpop.f32.mrf.mxu1 }
 0x261   :  { %v1077_v9 = vadd.f32 %v2274_v15, %v3314_v26  ;;  %v1346_v21 = vsel %vm1273_vm10, %v1072_v51, %v1314_v27  ;;  %v1174_v43 = vadd.f32 %v2338_v31, %v3314_v26  ;;  %v1695_v15 = vadd.f32 %v1694_v32, %v1664_v23  ;;  %v1630_v27 = vpop.permute.xlu1 %1629 }
 0x262   :  { %v3587_v45 = vsel %vm1362_vm11, %v1169_v48, %v1394_v7  ;;  %v2276_v58 = vpop.f32.mrf.mxu0  ;;  %v2340_v34 = vpop.f32.mrf.mxu1  ;;  %v1666_v48 = vmul.f32 %v1625_v16, %v1346_v21 }
 0x263   :  { %vm1274_vm13 = vcmp.gt.f32.partialorder %v1077_v9, 0.0  ;;  %v1315_v49 = vmul.f32 %v3320_v38, %v1077_v9  ;;  %v2277_v63 = vadd.f32 %v2276_v58, %v2275_v37  ;;  %v2341_v19 = vadd.f32 %v2340_v34, %v2339_v53 }
 0x264   :  { %v2342_v44 = vpop.f32.mrf.mxu1  ;;  %v1696_v11 = vadd.f32 %v1695_v15, %v1665_v0  ;;  %vm1363_vm14 = vcmp.gt.f32.partialorder %v1174_v43, 0.0  ;;  %v1395_v30 = vmul.f32 %v3320_v38, %v1174_v43 }
 0x265   :  { %v1347_v7 = vsel %vm1274_vm13, %v1077_v9, %v1315_v49  ;;  %v1080_v2 = vadd.f32 %v2277_v63, %v3314_v26  ;;  %v1177_v14 = vadd.f32 %v2341_v19, %v3314_v26  ;;  %v1635_v63 = vpop.permute.xlu0 %1634 }
 0x266   :  { %v2343_v39 = vpop.f32.mrf.mxu1  ;;  %v1667_v31 = vmul.f32 %v1630_v27, %v1347_v7  ;;  %v1697_v58 = vadd.f32 %v1696_v11, %v1666_v48  ;;  %v3604_v32 = vsel %vm1363_vm14, %v1174_v43, %v1395_v30  ;;  %v1817_v11 = vpack.c.bf16 %v3466_v40, %v3450_v36 }
 0x267   :  { %v2344_v13 = vadd.f32 %v2343_v39, %v2342_v44  ;;  %vm1275_vm15 = vcmp.gt.f32.partialorder %v1080_v2, 0.0  ;;  %v1316_v53 = vmul.f32 %v3320_v38, %v1080_v2  ;;  %vm1364_vm0 = vcmp.gt.f32.partialorder %v1177_v14, 0.0 }
 0x268   :  { %v1396_v23 = vmul.f32 %v3320_v38, %v1177_v14  ;;  %v2345_v37 = vpop.f32.mrf.mxu1  ;;  %v1698_v16 = vadd.f32 %v1697_v58, %v1667_v31 }
 0x269   :  { %v1182_v9 = vadd.f32 %v2344_v13, %v3314_v26  ;;  %v1348_v0 = vsel %vm1275_vm15, %v1080_v2, %v1316_v53  ;;  %v1824_v2 = vpack.c.bf16 %v1346_v21, %v3581_v60 }
 0x26a   :  { %v3602_v34 = vsel %vm1364_vm0, %v1177_v14, %v1396_v23  ;;  %v2346_v19 = vpop.f32.mrf.mxu1  ;;  %v1668_v44 = vmul.f32 %v1635_v63, %v1348_v0  ;;  %v1825_v27 = vpack.c.bf16 %v1348_v0, %v1347_v7  ;;  %v1712_v14 = vlaneseq }
 0x26b   :  { %v2347_v49 = vadd.f32 %v2346_v19, %v2345_v37  ;;  %v1884_v39 = vpack.c.bf16 %v3602_v34, %v3604_v32  ;;  %v1397_v51 = vmul.f32 %v3320_v38, %v1182_v9  ;;  %vm1365_vm1 = vcmp.gt.f32.partialorder %v1182_v9, 0.0 }
 0x26c   :  { %v2348_v15 = vpop.f32.mrf.mxu1  ;;  %v1699_v48 = vadd.f32 %v1698_v16, %v1668_v44  ;;  %2407 = vmatprep.subr.bf16.mxu1 %v1825_v27  ;;  %v3619_v40 = vshrl.u32 %v1712_v14, 7  ;;  %v3806_v32 = vpack.c.bf16 %v3587_v45, %v3592_v41  ;;  %v3807_v41 = vpack.c.bf16 %v3560_v5, %v3568_v47  ;;  %v3812_v5 = vld [vmem:[#allocation12_spill] sm:$0xff]  ;;  %v3813_v47 = vld [vmem:[#allocation13_spill] sm:$0xff] }
 0x26d   :  { %v1185_v13 = vadd.f32 %v2347_v49, %v3314_v26  ;;  %2408 = vmatpush3.bf16.xpose.msra.mxu1 %v1817_v11  ;;  %v3615_v58 = vsel %vm1365_vm1, %v1182_v9, %v1397_v51  ;;  %v1710_v49 = vpop.permute.xlu1 %1709  ;;  %v1816_v51 = vpack.c.bf16 %v3434_v54, %v3423_v17  ;;  %v3637_v17 = vld [vmem:[%s3773_s4] ss:$0 sm:$0xff]  ;;  %vm1940_vm1 = vcmask 1040384  }
 0x26e   :  { %v2349_v43 = vpop.f32.mrf.mxu1  ;;  %v1700_v31 = vrot.slane %v1699_v48, 4  ;;  %2409 = vmatprep.subr.bf16.mxu1 %v1824_v2 }
 0x26f   :  { %vm1366_vm2 = vcmp.gt.f32.partialorder %v1185_v13, 0.0  ;;  %v1398_v7 = vmul.f32 %v3320_v38, %v1185_v13  ;;  %v2350_v30 = vadd.f32 %v2349_v43, %v2348_v15  ;;  %v3628_v15 = vsub.s32 0, %v3619_v40 }
 0x270   :  { %v2351_v53 = vpop.f32.mrf.mxu1  ;;  %v1701_v37 = vadd.f32 %v1700_v31, %v1699_v48 }
 0x271   :  { %v1190_v23 = vadd.f32 %v2350_v30, %v3314_v26  ;;  %v3617_v36 = vsel %vm1366_vm2, %v1185_v13, %v1398_v7  ;;  %v1823_v13 = vpack.c.bf16 %v3572_v35, %v3564_v29  ;;  %vm1957_vm2 = vcmp.eq.s32.totalorder %v3619_v40, 0 }
 0x272   :  { %v2352_v63 = vpop.f32.mrf.mxu1  ;;  %v1885_v60 = vpack.c.bf16 %v3617_v36, %v3615_v58  ;;  %v1702_v19 = vrot.slane %v1701_v37, 2 }
 0x273   :  { %v2353_v21 = vadd.f32 %v2352_v63, %v2351_v53  ;;  %v1399_v44 = vmul.f32 %v3320_v38, %v1190_v23  ;;  %vm1367_vm3 = vcmp.gt.f32.partialorder %v1190_v23, 0.0 }
 0x274   :  { %v2354_v0 = vpop.f32.mrf.mxu1  ;;  %v1703_v9 = vadd.f32 %v1702_v19, %v1701_v37  ;;  %v1815_v19 = vpack.c.bf16 %v3413_v55, %v3409_v33 }
 0x275   :  { %v1193_v16 = vadd.f32 %v2353_v21, %v3314_v26  ;;  %2410 = vmatpush3.bf16.xpose.msra.mxu1 %v1816_v51  ;;  %v1715_v26 = vrot.slane %v1710_v49, %v3628_v15  ;;  %v3640_v7 = vsel %vm1367_vm3, %v1190_v23, %v1399_v44  ;;  %v1822_v49 = vpack.c.bf16 %v3554_v62, %v3541_v18 }
 0x276   :  { %v2355_v27 = vpop.f32.mrf.mxu1  ;;  %v1704_v14 = vrot.slane %v1703_v9, 1  ;;  %2411 = vmatprep.subr.bf16.mxu1 %v1823_v13  ;;  %v1821_v62 = vpack.c.bf16 %v3533_v56, %v3522_v12  ;;  %v3799_v13 = vpack.c.bf16 %v3387_v4, %v3385_v1 }
 0x277   :  { %vm1368_vm4 = vcmp.gt.f32.partialorder %v1193_v16, 0.0  ;;  %v1400_v11 = vmul.f32 %v3320_v38, %v1193_v16  ;;  %v2356_v48 = vadd.f32 %v2355_v27, %v2354_v0 }
 0x278   :  { %v2357_v43 = vpop.f32.mrf.mxu1  ;;  %v1705_v2 = vadd.f32 %v1704_v14, %v1703_v9 }
 0x279   :  { %v1198_v54 = vadd.f32 %v3637_v17, %v2356_v48  ;;  %v3642_v29 = vsel %vm1368_vm4, %v1193_v16, %v1400_v11 }
 0x27a   :  { %v2358_v35 = vpop.f32.mrf.mxu1  ;;  %v1886_v30 = vpack.c.bf16 %v3642_v29, %v3640_v7  ;;  %v1716_v53 = vmul.f32 %v1715_v26, %v1705_v2  ;;  %v1820_v2 = vpack.c.bf16 %v3514_v20, %v3503_v52  ;;  %v1830_v7 = vpop.permute.xlu0 %1829 }
 0x27b   :  { %v2359_v31 = vadd.f32 %v2358_v35, %v2357_v43  ;;  %v1401_v63 = vmul.f32 %v3320_v38, %v1198_v54  ;;  %vm1369_vm5 = vcmp.gt.f32.partialorder %v1198_v54, 0.0  ;;  %v3800_v35 = vpack.c.bf16 %v3373_v25, %v3371_v24 }
 0x27c   :  { %v3646_v37 = vpop.f32.mrf.mxu1  ;;  %v2115_v0 = vmul.f32 -1.442695, %v1716_v53  ;;  %v3802_v53 = vpack.c.bf16 %v3470_v28, %v3473_v59  ;;  %v1835_v29 = vrot.slane %v1830_v7, %v3628_v15 }
 0x27d   :  { %v1201_v21 = vadd.f32 %v3637_v17, %v2359_v31  ;;  %2412 = vmatpush3.bf16.xpose.msra.mxu1 %v1815_v19  ;;  %v3659_v51 = vsel %vm1369_vm5, %v1198_v54, %v1401_v63  ;;  %v3801_v31 = vpack.c.bf16 %v3359_v3, %v3357_v42  ;;  %v3804_v42 = vpack.c.bf16 %v3437_v61, %v3444_v50 }
 0x27e   :  { %v3652_v23 = vpop.f32.mrf.mxu1  ;;  %2684 = vpow2.f32 %v2115_v0  ;;  %2413 = vmatprep.subr.bf16.mxu1 %v1822_v49  ;;  %v3803_v0 = vpack.c.bf16 %v3345_v10, %v3343_v8  ;;  %vm2008_vm5 = vcmask 1041408  }
 0x27f   :  { %vm1370_vm6 = vcmp.gt.f32.partialorder %v1201_v21, 0.0  ;;  %v1402_v44 = vmul.f32 %v3320_v38, %v1201_v21 }
 0x280   :  { %v3657_v16 = vpop.f32.mrf.mxu1 }
 0x281   :  { %v3661_v9 = vsel %vm1370_vm6, %v1201_v21, %v1402_v44  ;;  %vm2021_vm6 = vcmask 0  }
 0x282   :  { %v3663_v33 = vpop.f32.mrf.mxu1  ;;  %v1887_v55 = vpack.c.bf16 %v3661_v9, %v3659_v51 }
 0x284   :  { %v3667_v27 = vpop.f32.mrf.mxu1 }
 0x285   :  { %2414 = vmatpush3.bf16.xpose.msra.mxu1 %v3799_v13 }
 0x286   :  { %v3669_v18 = vpop.f32.mrf.mxu1  ;;  %2415 = vmatprep.subr.bf16.mxu1 %v1821_v62 }
 0x288   :  { %v2369_v11 = vpop.f32.mrf.mxu1 }
 0x28a   :  { %v2370_v48 = vpop.f32.mrf.mxu1 }
 0x28b   :  { %v2685_v14 = vpop.eup %2684 }
 0x28c   :  { %v2372_v26 = vpop.f32.mrf.mxu1  ;;  %v1720_v43 = vadd.f32 1.0, %v2685_v14 }
 0x28d   :  { %2416 = vmatpush3.bf16.xpose.msra.mxu1 %v3800_v35  ;;  %v3805_v35 = vpack.c.bf16 %v3331_v57, %v3329_v6  ;;  %v2368_v6 = vadd.f32 %v3669_v18, %v3667_v27 }
 0x28e   :  { %v2373_v54 = vpop.f32.mrf.mxu1  ;;  %2686 = vrcp.f32 %v1720_v43  ;;  %2417 = vmatprep.subr.bf16.mxu1 %v1820_v2 }
 0x28f   :  { %v2374_v61 = vadd.f32 %v2373_v54, %v2372_v26  ;;  %v2371_v54 = vadd.f32 %v2370_v48, %v2369_v11 }
 0x290   :  { %v2375_v12 = vpop.f32.mrf.mxu1 }
 0x292   :  { %v2376_v56 = vpop.f32.mrf.mxu1 }
 0x293   :  { %v2377_v14 = vadd.f32 %v2376_v56, %v2375_v12 }
 0x294   :  { %v2378_v1 = vpop.f32.mrf.mxu1 }
 0x295   :  { %2418 = vmatpush3.bf16.xpose.msra.mxu1 %v3801_v31  ;;  %v1225_v12 = vadd.f32 %v3637_v17, %v2377_v14 }
 0x296   :  { %v2379_v4 = vpop.f32.mrf.mxu1  ;;  %2419 = vmatprep.subr.bf16.mxu1 %v3802_v53  ;;  %v1222_v53 = vadd.f32 %v3637_v17, %v2374_v61 }
 0x297   :  { %v2380_v19 = vadd.f32 %v2379_v4, %v2378_v1  ;;  %vm1376_vm11 = vcmp.gt.f32.partialorder %v1225_v12, 0.0 }
 0x298   :  { %v2381_v63 = vpop.f32.mrf.mxu1  ;;  %v1407_v57 = vmul.f32 %v3320_v38, %v1222_v53  ;;  %vm1375_vm12 = vcmp.gt.f32.partialorder %v1222_v53, 0.0 }
 0x299   :  { %v1230_v62 = vadd.f32 %v3637_v17, %v2380_v19 }
 0x29a   :  { %v2382_v52 = vpop.f32.mrf.mxu1  ;;  %v1439_v11 = vsel %vm1375_vm12, %v1222_v53, %v1407_v57 }
 0x29b   :  { %v2687_v20 = vpop.eup %2686  ;;  %v2383_v24 = vadd.f32 %v2382_v52, %v2381_v63  ;;  %v1409_v50 = vmul.f32 %v3320_v38, %v1230_v62  ;;  %vm1377_vm10 = vcmp.gt.f32.partialorder %v1230_v62, 0.0  ;;  %v1408_v52 = vmul.f32 %v3320_v38, %v1225_v12 }
 0x29c   :  { %v2384_v21 = vpop.f32.mrf.mxu1  ;;  %2572 = vmatmul.mubr.f32.vlgmr.msra.gmra.mxu0 %v2687_v20  ;;  %v1217_v20 = vadd.f32 %v3637_v17, %v2371_v54 }
 0x29d   :  { %2420 = vmatpush3.bf16.xpose.msra.mxu1 %v3803_v0  ;;  %v1233_v28 = vadd.f32 %v3637_v17, %v2383_v24  ;;  %v1441_v63 = vsel %vm1377_vm10, %v1230_v62, %v1409_v50  ;;  %v1214_v24 = vadd.f32 %v3637_v17, %v2368_v6  ;;  %v3818_v62 = vld [vmem:[#allocation8_spill] sm:$0xff] }
 0x29e   :  { %v2385_v25 = vpop.f32.mrf.mxu1  ;;  %2421 = vmatprep.subr.bf16.mxu1 %v3804_v42  ;;  %v1406_v34 = vmul.f32 %v3320_v38, %v1217_v20  ;;  %vm1374_vm13 = vcmp.gt.f32.partialorder %v1217_v20, 0.0 }
 0x29f   :  { %v2386_v49 = vadd.f32 %v2385_v25, %v2384_v21  ;;  %v1410_v43 = vmul.f32 %v3320_v38, %v1233_v28  ;;  %vm1378_vm7 = vcmp.gt.f32.partialorder %v1233_v28, 0.0  ;;  %v1440_v21 = vsel %vm1376_vm11, %v1225_v12, %v1408_v52 }
 0x2a0   :  { %v2387_v3 = vpop.f32.mrf.mxu1  ;;  %v1890_v48 = vpack.c.bf16 %v1440_v21, %v1439_v11  ;;  %v2365_v25 = vadd.f32 %v3663_v33, %v3657_v16  ;;  %v1405_v27 = vmul.f32 %v3320_v38, %v1214_v24  ;;  %vm1373_vm14 = vcmp.gt.f32.partialorder %v1214_v24, 0.0 }
 0x2a1   :  { %v1238_v59 = vadd.f32 %v3637_v17, %v2386_v49  ;;  %v1442_v4 = vsel %vm1378_vm7, %v1233_v28, %v1410_v43  ;;  %v1438_v19 = vsel %vm1374_vm13, %v1217_v20, %v1406_v34  ;;  %v3810_v28 = vld [vmem:[#allocation15_spill] sm:$0xff] }
 0x2a2   :  { %v2388_v44 = vpop.f32.mrf.mxu1  ;;  %v1891_v26 = vpack.c.bf16 %v1442_v4, %v1441_v63  ;;  %v1209_v18 = vadd.f32 %v3637_v17, %v2365_v25  ;;  %v1437_v16 = vsel %vm1373_vm14, %v1214_v24, %v1405_v27  ;;  %v3821_v25 = vmov 0.0  }
 0x2a3   :  { %v2389_v13 = vadd.f32 %v2388_v44, %v2387_v3  ;;  %v1411_v8 = vmul.f32 %v3320_v38, %v1238_v59  ;;  %vm1379_vm8 = vcmp.gt.f32.partialorder %v1238_v59, 0.0  ;;  %v1889_v33 = vpack.c.bf16 %v1438_v19, %v1437_v16  ;;  %v3815_v44 = vld [vmem:[#allocation10_spill] sm:$0xff] }
 0x2a4   :  { %v1404_v49 = vmul.f32 %v3320_v38, %v1209_v18  ;;  %vm1372_vm15 = vcmp.gt.f32.partialorder %v1209_v18, 0.0  ;;  %v3808_v3 = vpack.c.bf16 %v3537_v46, %v3544_v22  ;;  %v3816_v46 = vld [vmem:[#allocation11_spill] sm:$0xff]  ;;  %v2117_v34 = vsel %vm1957_vm2, 1.0, %v3821_v25 }
 0x2a5   :  { %v1241_v10 = vadd.f32 %v3637_v17, %v2389_v13  ;;  %2422 = vmatpush3.bf16.xpose.msra.mxu1 %v3805_v35  ;;  %v1443_v56 = vsel %vm1379_vm8, %v1238_v59, %v1411_v8  ;;  %v3817_v22 = vpack.c.bf16 %v3815_v44, %v3816_v46  ;;  %v3819_v13 = vld [vmem:[#allocation9_spill] sm:$0xff] }
 0x2a6   :  { %v3820_v51 = vpack.c.bf16 %v3818_v62, %v3819_v13 }
 0x2a7   :  { %vm1380_vm9 = vcmp.gt.f32.partialorder %v1241_v10, 0.0  ;;  %v1412_v2 = vmul.f32 %v3320_v38, %v1241_v10 }
 0x2a9   :  { %v1444_v1 = vsel %vm1380_vm9, %v1241_v10, %v1412_v2 }
 0x2aa   :  { %v1892_v31 = vpack.c.bf16 %v1444_v1, %v1443_v56 }
 0x2ac   :  { %2425 = vmatprep.subr.bf16.mxu0 %v1892_v31 }
 0x2ad   :  { %2426 = vmatpush3.bf16.xpose.msra.mxu0 %v1884_v39  ;;  %v2362_v39 = vadd.f32 %v3652_v23, %v3646_v37  ;;  %v1436_v37 = vsel %vm1372_vm15, %v1209_v18, %v1404_v49  ;;  %v1994_v49 = vld [vmem:[%s3777_s9] sm:$0x3]  ;;  %s2722_s9 = smov [#allocation5]  }
 0x2ae   :  { %2427 = vmatprep.subr.bf16.mxu0 %v1891_v26  ;;  %s2031_s3 = sshll.u32 %s2722_s9, 4  ;;  %s2032_s3 = int_to_ptr.vmem [resolvable:$true] %s2031_s3 }
 0x2af   :  { %v1206_v0 = vadd.f32 %v3637_v17, %v2362_v39  ;;  %v3809_v17 = vld [vmem:[#allocation14_spill] sm:$0xff]  ;;  %s2697_s7 = scalar_lea.vmem %s2032_s3, 16  ;;  %s2701_s10 = scalar_lea.vmem %s2032_s3, 32 }
 0x2b0   :  { %v3811_v59 = vpack.c.bf16 %v3809_v17, %v3810_v28  ;;  %p2698_p0 = scmp.ne.s32.totalorder %s2032_s3, %s2697_s7  ;;  %p2702_p1 = scmp.lt.s32.totalorder %s2032_s3, %s2032_s3 }
 0x2b1   :  { %v1403_v45 = vmul.f32 %v3320_v38, %v1206_v0  ;;  %vm1371_vm0 = vcmp.gt.f32.partialorder %v1206_v0, 0.0  ;;  %v3814_v38 = vpack.c.bf16 %v3812_v5, %v3813_v47  ;;  %p2703_p2 = scmp.lt.s32.totalorder %s2701_s10, %s2697_s7 }
 0x2b3   :  { %v1435_v23 = vsel %vm1371_vm0, %v1206_v0, %v1403_v45  ;;  %p2704_p3 = por %p2703_p2, %p2702_p1 }
 0x2b4   :  { %v1888_v42 = vpack.c.bf16 %v1436_v37, %v1435_v23 }
 0x2b5   :  { %2428 = vmatpush3.bf16.xpose.msra.mxu0 %v3806_v32  ;;  %p2705_p4 = pnand %p2704_p3, %p2698_p0 }
 0x2b6   :  { %2429 = vmatprep.subr.bf16.mxu0 %v1890_v48 }
 0x2bd   :  { %2430 = vmatpush3.bf16.xpose.msra.mxu0 %v3807_v41  ;;  %v2002_v41 = vsub.s32 1, %v3619_v40 }
 0x2be   :  { %2431 = vmatprep.subr.bf16.mxu0 %v1889_v33 }
 0x2bf   :  { %v2003_v46 = vrot.slane %v1994_v49, %v2002_v41 }
 0x2c5   :  { %2432 = vmatpush3.bf16.xpose.msra.mxu0 %v3808_v3 }
 0x2c6   :  { %2433 = vmatprep.subr.bf16.mxu0 %v1888_v42 }
 0x2cd   :  { %2434 = vmatpush3.bf16.xpose.msra.mxu0 %v3811_v59  ;;  %v1999_v59 = vrot.slane %v1994_v49, %v3628_v15 }
 0x2ce   :  { %2435 = vmatprep.subr.bf16.mxu0 %v1887_v55 }
 0x2d5   :  { %2436 = vmatpush3.bf16.xpose.msra.mxu0 %v3814_v38 }
 0x2d6   :  { %2437 = vmatprep.subr.bf16.mxu0 %v1886_v30 }
 0x2dd   :  { %2438 = vmatpush3.bf16.xpose.msra.mxu0 %v3817_v22 }
 0x2de   :  { %2439 = vmatprep.subr.bf16.mxu0 %v1885_v60 }
 0x2e5   :  { %2440 = vmatpush3.bf16.xpose.msra.mxu0 %v3820_v51 }
 0x35c   :  { %v1805_v9 = vpop.f32.mrf.mxu0 }
 0x35d   :  { %v1809_v55 = vpack.c.bf16 %v1805_v9, %v1805_v9 }
 0x35e   :  { %v2573_v14 = vpop.f32.mrf.mxu0 }
 0x35f   :  { %2423 = vmatprep.mubr.bf16.mxu1 %v1809_v55  ;;  %2441 = vmatprep.mubr.bf16.mxu0 %v1809_v55 }
 0x360   :  { %2424 = vmatmul.mubr.bf16.vlgmr.msra.gmra.mxu1 %v1809_v55  ;;  %2442 = vmatmul.mubr.bf16.vlgmr.msra.gmra.mxu0 %v1809_v55 }
 0x420   :  { %v1870_v30 = vpop.f32.mrf.mxu1  ;;  %v1927_v43 = vpop.f32.mrf.mxu0 }
 0x421   :  { %v1928_v8 = vadd.f32 %v1927_v43, %v1835_v29  ;;  %v1871_v60 = vadd.f32 %v1870_v30, %v1835_v29 }
 0x422   :  { %v1872_v58 = vpop.f32.mrf.mxu1  ;;  %v1929_v36 = vpop.f32.mrf.mxu0 }
 0x423   :  { %v1936_v10 = vrot.slane %v1928_v8, 7  ;;  %v1930_v61 = vadd.f32 %v1929_v36, %v1835_v29  ;;  %v1873_v12 = vadd.f32 %v1872_v58, %v1835_v29 }
 0x424   :  { %v1874_v50 = vpop.f32.mrf.mxu1  ;;  %v1931_v2 = vpop.f32.mrf.mxu0 }
 0x425   :  { %v1941_v35 = vsel %vm1940_vm1, %v1871_v60, %v1936_v10  ;;  %v1937_v56 = vrot.slane %v1930_v61, 7 }
 0x426   :  { %v1966_v1 = vand.u32 2147483647, %v1941_v35  ;;  %v1875_v4 = vpop.f32.mrf.mxu1  ;;  %v1932_v31 = vpop.f32.mrf.mxu0  ;;  %v1960_v27 = vmax.f32 %v1941_v35, 0.0  ;;  %v1962_v18 = vmul.f32 %v2117_v34, %v1941_v35 }
 0x427   :  { %v1942_v53 = vsel %vm1940_vm1, %v1873_v12, %v1937_v56 }
 0x428   :  { %v1968_v63 = vsub.f32 0.0, %v1966_v1  ;;  %v1945_v26 = vcombine.low %v1941_v35, %v1942_v53  ;;  %v1967_v54 = vand.u32 2147483647, %v1942_v53  ;;  %v1961_v16 = vmax.f32 %v1942_v53, 0.0 }
 0x429   :  { %v1963_v45 = vmul.f32 %v2117_v34, %v1942_v53  ;;  %v1964_v3 = vsub.f32 %v1960_v27, %v1962_v18 }
 0x42a   :  { %v1970_v52 = vmul.f32 1.442695, %v1968_v63  ;;  %2116 = vst.sshfl [vmem:[%s3778_s11] sm:$0x33 pattern:$0x76325410] %v1945_v26  ;;  %v1969_v6 = vsub.f32 0.0, %v1967_v54 }
 0x42b   :  { %v1965_v44 = vsub.f32 %v1961_v16, %v1963_v45 }
 0x42c   :  { %2688 = vpow2.f32 %v1970_v52  ;;  %v1972_v57 = vmul.f32 1.442695, %v1969_v6 }
 0x42e   :  { %2690 = vpow2.f32 %v1972_v57 }
 0x439   :  { %v2689_v20 = vpop.eup %2688 }
 0x43a   :  { %v1974_v21 = vadd.f32 1.0, %v2689_v20  ;;  %v1977_v48 = vmul.f32 -0.5, %v2689_v20  ;;  %v1980_v19 = vand.u32 2147483647, %v2689_v20 }
 0x43b   :  { %v2691_v24 = vpop.eup %2690 }
 0x43c   :  { %2692 = vlog2.f32 %v1974_v21  ;;  %v1983_v11 = vadd.f32 1.0, %v2691_v24  ;;  %v1986_v32 = vmul.f32 -0.5, %v2691_v24  ;;  %v1978_v39 = vadd.f32 1.0, %v1977_v48 }
 0x43d   :  { %v1989_v42 = vand.u32 2147483647, %v2691_v24  ;;  %vm1981_vm3 = vcmp.lt.f32.partialorder %v1980_v19, 0.0004427343 }
 0x43e   :  { %2694 = vlog2.f32 %v1983_v11  ;;  %v1987_v33 = vadd.f32 1.0, %v1986_v32  ;;  %v1979_v23 = vmul.f32 %v2689_v20, %v1978_v39 }
 0x43f   :  { %vm1990_vm4 = vcmp.lt.f32.partialorder %v1989_v42, 0.0004427343 }
 0x440   :  { %v1988_v47 = vmul.f32 %v2691_v24, %v1987_v33 }
 0x449   :  { %v2693_v0 = vpop.eup %2692 }
 0x44a   :  { %v1976_v37 = vmul.f32 0.6931472, %v2693_v0 }
 0x44b   :  { %v2695_v17 = vpop.eup %2694 }
 0x44c   :  { %v1982_v28 = vsel %vm1981_vm3, %v1979_v23, %v1976_v37  ;;  %v1985_v5 = vmul.f32 0.6931472, %v2695_v17 }
 0x44d   :  { %v1992_v38 = vadd.f32 %v1982_v28, %v1964_v3 }
 0x44e   :  { %v1991_v22 = vsel %vm1990_vm4, %v1988_v47, %v1985_v5 }
 0x44f   :  { %v1993_v62 = vadd.f32 %v1991_v22, %v1965_v44  ;;  %v2006_v13 = vmul.f32 %v1999_v59, %v1992_v38 }
 0x451   :  { %v2007_v40 = vmul.f32 %v2003_v46, %v1993_v62  ;;  %v2009_v51 = vsel %vm2008_vm5, %v2006_v13, 0.0 }
 0x453   :  { %v2010_v9 = vsel %vm2008_vm5, %v2007_v40, 0.0 }
 0x454   :  { %v2011_v55 = vadd.f32 %v2010_v9, %v2009_v51 }
 0x456   :  { %2012 = vadd.xlane.f32.xlu1 %v2011_v55 }
 0x4df   :  { %v2013_v14 = vpop.xlane.xlu1 %2012 }
 0x4e0   :  { %v2014_v7 = vsel %vm2008_vm5, %v2013_v14, 0.0 }
 0x4e1   :  { %v2015_v29 = vrot.slane %v2014_v7, 4 }
 0x4e3   :  { %v2016_v30 = vadd.f32 %v2015_v29, %v2014_v7 }
 0x4e5   :  { %v2017_v15 = vrot.slane %v2016_v30, 2 }
 0x4e7   :  { %v2018_v43 = vadd.f32 %v2017_v15, %v2016_v30 }
 0x4e9   :  { %v2019_v8 = vrot.slane %v2018_v43, 1 }
 0x4eb   :  { %v2020_v58 = vadd.f32 %v2019_v8, %v2018_v43 }
 0x4ed   :  { %2022 = vst.msk [vmem:[#allocation5] sm:$0x1] %vm2021_vm6, %v2020_v58 }
 0x4ee   :  { %2708 = shalt.err (!%p2705_p4)
}
 0x4ef   :  { %2034 = dma.vmem_to_hbm [thread:$0]  %s2032_s3, 16, %s3779_s12, [#allocation6]  }
 0x4f0   :  { %2717 = dma.done.wait [#allocation6], 16  }
 0x4f1   :  { %2718 = vsyncadd [#allocation6], 4294967280 }
 0x4f2   :  { %2040 = vsyncpa [#allocation6], 1 }

</bundles_post_ra>
